<compile_context>
chip_gen: v7x
topology: tpu7x:2x2x1
jax: 0.10.0
libtpu: 0.0.40
codegen_flags: <defaults>
</compile_context>

<pallas_src>
import functools

import jax
import jax.numpy as jnp
from jax.experimental import pallas as pl
from jax.experimental.pallas import tpu as pltpu


# MXU operand dtype (accumulation is always fp32).  Set to jnp.float32 to get
# bit-closer agreement with a fp32 PyTorch reference.
COMPUTE_DTYPE = jnp.bfloat16


def _pick_row_tile(m, pref=512):
    """Largest 8-aligned tile <= pref that divides m (fallback: m itself)."""
    for t in (pref, 1024, 512, 256, 128, 64, 32, 16, 8):
        if t <= m and m % t == 0:
            return t
    return m


# ------------------------- Pallas kernels -------------------------

def _mm_stats_kernel(a_ref, b_ref, y_ref, ssum_ref, ssq_ref, *, cdt):
    """[tm, K] @ [K, C] with fused per-channel sum / sum-sq epilogue."""
    acc = jnp.dot(a_ref[...].astype(cdt), b_ref[...],
                  preferred_element_type=jnp.float32)
    y_ref[...] = acc
    ssum_ref[0] = jnp.sum(acc, axis=0, keepdims=True)
    ssq_ref[0] = jnp.sum(acc * acc, axis=0, keepdims=True)


def matmul_stats(a, w, compute_dtype=COMPUTE_DTYPE):
    """y = a @ w plus per-tile partial channel stats (summed in the wrapper)."""
    M, K = a.shape
    C = w.shape[1]
    tm = _pick_row_tile(M)
    G = M // tm
    y, ssum, ssq = pl.pallas_call(
        functools.partial(_mm_stats_kernel, cdt=compute_dtype),
        out_shape=(jax.ShapeDtypeStruct((M, C), jnp.float32),
                   jax.ShapeDtypeStruct((G, 1, C), jnp.float32),
                   jax.ShapeDtypeStruct((G, 1, C), jnp.float32)),
        grid=(G,),
        in_specs=[
            pl.BlockSpec((tm, K), lambda i: (i, 0)),
            pl.BlockSpec((K, C), lambda i: (0, 0)),
        ],
        out_specs=(pl.BlockSpec((tm, C), lambda i: (i, 0)),
                   pl.BlockSpec((1, 1, C), lambda i: (i, 0, 0)),
                   pl.BlockSpec((1, 1, C), lambda i: (i, 0, 0))),
        compiler_params=pltpu.CompilerParams(dimension_semantics=("parallel",)),
    )(a, w.astype(compute_dtype))
    return y, jnp.sum(ssum, axis=0), jnp.sum(ssq, axis=0)


def _conv3x3_kernel(x_ref, sc_ref, sh_ref, w_ref, y_ref, ssum_ref, ssq_ref,
                    zp_ref, *, relu_in, cdt):
    """Fused: z = affine(x) [+ReLU]  ->  3x3 conv (9 shifted MXU taps)
    -> write conv output + per-image channel sum / sum-sq."""
    H, W, Cin = x_ref.shape[1], x_ref.shape[2], x_ref.shape[3]
    Cout = w_ref.shape[2]

    # Previous stage's BatchNorm (and optional ReLU) fused into the read.
    z = x_ref[0] * sc_ref[...] + sh_ref[...]
    if relu_in:
        z = jnp.maximum(z, 0.0)

    # Zero-padded copy in VMEM (padding=1).  TODO(synk): for large H/W, tile
    # rows with a 1-row halo instead of holding the full image in VMEM.
    zp_ref[...] = jnp.zeros_like(zp_ref)
    zp_ref[pl.ds(1, H), pl.ds(1, W), :] = z

    acc = jnp.zeros((H * W, Cout), jnp.float32)
    for k in range(9):                       # static unroll: 9 shifted taps
        dy, dx = k // 3, k % 3
        patch = zp_ref[pl.ds(dy, H), pl.ds(dx, W), :]
        acc = acc + jnp.dot(patch.reshape(H * W, Cin).astype(cdt), w_ref[k],
                            preferred_element_type=jnp.float32)

    y_ref[0] = acc.reshape(H, W, Cout)
    ssum_ref[0] = jnp.sum(acc, axis=0, keepdims=True)
    ssq_ref[0] = jnp.sum(acc * acc, axis=0, keepdims=True)


def conv3x3_fused(y_prev, scale, shift, w_taps, relu_in,
                  compute_dtype=COMPUTE_DTYPE):
    """3x3 / pad=1 conv over NHWC with fused input affine(+ReLU) and output
    channel statistics.  Grid over batch images (parallel)."""
    N, H, W, Cin = y_prev.shape
    Cout = w_taps.shape[2]
    y, ssum, ssq = pl.pallas_call(
        functools.partial(_conv3x3_kernel, relu_in=relu_in, cdt=compute_dtype),
        out_shape=(jax.ShapeDtypeStruct((N, H, W, Cout), jnp.float32),
                   jax.ShapeDtypeStruct((N, 1, Cout), jnp.float32),
                   jax.ShapeDtypeStruct((N, 1, Cout), jnp.float32)),
        grid=(N,),
        in_specs=[
            pl.BlockSpec((1, H, W, Cin), lambda n: (n, 0, 0, 0)),
            pl.BlockSpec((1, Cin), lambda n: (0, 0)),
            pl.BlockSpec((1, Cin), lambda n: (0, 0)),
            pl.BlockSpec((9, Cin, Cout), lambda n: (0, 0, 0)),
        ],
        out_specs=(pl.BlockSpec((1, H, W, Cout), lambda n: (n, 0, 0, 0)),
                   pl.BlockSpec((1, 1, Cout), lambda n: (n, 0, 0)),
                   pl.BlockSpec((1, 1, Cout), lambda n: (n, 0, 0))),
        scratch_shapes=[pltpu.VMEM((H + 2, W + 2, Cin), jnp.float32)],
        compiler_params=pltpu.CompilerParams(dimension_semantics=("parallel",)),
    )(y_prev, scale, shift, w_taps.astype(compute_dtype))
    return y, jnp.sum(ssum, axis=0), jnp.sum(ssq, axis=0)


def _affine_kernel(x_ref, sc_ref, sh_ref, o_ref, *, relu):
    y = x_ref[...] * sc_ref[...] + sh_ref[...]
    if relu:
        y = jnp.maximum(y, 0.0)
    o_ref[...] = y


def bn_apply(y2d, scale, shift, relu):
    """Apply y*scale + shift (+ReLU) over [M, C].  Lane-densified to 128-wide
    rows when C divides 128 so stores are full-lane; tiled + parallel grid."""
    M, C = y2d.shape
    if 128 % C == 0 and (M * C) % 128 == 0:
        rep = 128 // C
        R = (M * C) // 128
        x = y2d.reshape(R, 128)
        sc = jnp.tile(scale.reshape(1, C), (1, rep))
        sh = jnp.tile(shift.reshape(1, C), (1, rep))
    else:
        R, x = M, y2d
        sc, sh = scale.reshape(1, C), shift.reshape(1, C)
    Wd = x.shape[1]
    tr = _pick_row_tile(R, pref=1024)
    out = pl.pallas_call(
        functools.partial(_affine_kernel, relu=relu),
        out_shape=jax.ShapeDtypeStruct((R, Wd), jnp.float32),
        grid=(R // tr,),
        in_specs=[
            pl.BlockSpec((tr, Wd), lambda i: (i, 0)),
            pl.BlockSpec((1, Wd), lambda i: (0, 0)),
            pl.BlockSpec((1, Wd), lambda i: (0, 0)),
        ],
        out_specs=pl.BlockSpec((tr, Wd), lambda i: (i, 0)),
        compiler_params=pltpu.CompilerParams(dimension_semantics=("parallel",)),
    )(x, sc, sh)
    return out.reshape(M, C)


# ------------------------- BN coefficient math (tiny, XLA) -------------------------

def bn_coeffs(ssum, ssq, count, gamma, beta, eps=1e-5):
    mean = ssum / count                         # (1, C)
    var = ssq / count - mean * mean             # biased (PyTorch training norm)
    scale = gamma.reshape(1, -1) / jnp.sqrt(var + eps)
    shift = beta.reshape(1, -1) - mean * scale
    return scale.astype(jnp.float32), shift.astype(jnp.float32)


# ------------------------- Down forward -------------------------

def down_forward(x_nchw, params):
    x = jnp.transpose(x_nchw, (0, 2, 3, 1)).astype(jnp.float32)   # NCHW -> NHWC
    N, H, W, Cin = x.shape
    Ho, Wo = H // 2, W // 2
    M = N * Ho * Wo

    # --- Conv2d(in, down, 2, stride=2) + BN stats (bias cancels under BN) ---
    # Non-overlapping 2x2 patches -> space-to-depth (no data duplication).
    p0 = x.reshape(N, Ho, 2, Wo, 2, Cin).transpose(0, 1, 3, 2, 4, 5)
    p0 = p0.reshape(M, 4 * Cin)
    w0 = jnp.transpose(params["w0"], (2, 3, 1, 0)).reshape(4 * Cin, -1)
    Cd = w0.shape[1]
    y0, s0, q0 = matmul_stats(p0, w0)
    sc0, sh0 = bn_coeffs(s0, q0, M, params["g0"], params["be0"])
    y0 = y0.reshape(N, Ho, Wo, Cd)

    # --- Conv2d(down, mid, 3, pad=1): BN0 fused into the read, stats fused ---
    w1 = jnp.transpose(params["w1"], (2, 3, 1, 0)).reshape(9, Cd, -1)
    y1, s1, q1 = conv3x3_fused(y0, sc0, sh0, w1, relu_in=False)
    sc1, sh1 = bn_coeffs(s1, q1, M, params["g1"], params["be1"])
    Cm = w1.shape[2]

    # --- Conv2d(mid, out, 3, pad=1): BN1 + ReLU fused into the read ---
    w2 = jnp.transpose(params["w2"], (2, 3, 1, 0)).reshape(9, Cm, -1)
    y2, s2, q2 = conv3x3_fused(y1, sc1, sh1, w2, relu_in=True)
    sc2, sh2 = bn_coeffs(s2, q2, M, params["g2"], params["be2"])
    Co = w2.shape[2]

    # --- Final BN2 + ReLU (lane-dense elementwise pass) ---
    out = bn_apply(y2.reshape(M, Co), sc2, sh2, relu=True)
    return jnp.transpose(out.reshape(N, Ho, Wo, Co), (0, 3, 1, 2))  # -> NCHW


def init_params(key, in_ch, down_ch, mid_ch, out_ch):
    # Conv biases are omitted: each conv feeds a training-mode BatchNorm that
    # subtracts the per-channel batch mean, so a constant bias cancels exactly.
    ks = jax.random.split(key, 9)
    return {
        "w0": 0.1 * jax.random.normal(ks[0], (down_ch, in_ch, 2, 2), jnp.float32),
        "g0": 1.0 + 0.1 * jax.random.normal(ks[1], (down_ch,), jnp.float32),
        "be0": 0.1 * jax.random.normal(ks[2], (down_ch,), jnp.float32),
        "w1": 0.1 * jax.random.normal(ks[3], (mid_ch, down_ch, 3, 3), jnp.float32),
        "g1": 1.0 + 0.1 * jax.random.normal(ks[4], (mid_ch,), jnp.float32),
        "be1": 0.1 * jax.random.normal(ks[5], (mid_ch,), jnp.float32),
        "w2": 0.1 * jax.random.normal(ks[6], (out_ch, mid_ch, 3, 3), jnp.float32),
        "g2": 1.0 + 0.1 * jax.random.normal(ks[7], (out_ch,), jnp.float32),
        "be2": 0.1 * jax.random.normal(ks[8], (out_ch,), jnp.float32),
    }


if __name__ == "__main__":
    # Down(in_channels=4, down_channels=8, middle_channels=16, out_channels=32)
    N, Cin, H, W = 2, 4, 16, 16
    down_ch, mid_ch, out_ch = 8, 16, 32

    key = jax.random.PRNGKey(0)
    kx, kp = jax.random.split(key)
    x = jax.random.normal(kx, (N, Cin, H, W), jnp.float32)
    params = init_params(kp, Cin, down_ch, mid_ch, out_ch)

    y = jax.jit(down_forward)(x, params)
    y = jax.block_until_ready(y)

    assert y.shape == (N, out_ch, H // 2, W // 2), y.shape
    assert bool(jnp.all(jnp.isfinite(y)))
    print("KERNEL_OK")
</pallas_src>

<mosaic_0001>
module attributes {stable_mosaic.version = 11 : i64} {
  func.func @_mm_stats_kernel(%arg0: i32, %arg1: memref<128x16xf32, #tpu.memory_space<vmem>>, %arg2: memref<16x8xbf16, #tpu.memory_space<vmem>>, %arg3: memref<128x8xf32, #tpu.memory_space<vmem>>, %arg4: memref<1x1x8xf32, #tpu.memory_space<vmem>>, %arg5: memref<1x1x8xf32, #tpu.memory_space<vmem>>) attributes {dimension_semantics = [#tpu.dimension_semantics<parallel>], iteration_bounds = array<i64: 1>, scalar_prefetch = 0 : i64, scratch_operands = 0 : i64, tpu.core_type = #tpu.core_type<tc>, window_params = [{transform_indices = @transform_0, window_bounds = array<i64: 128, 16>}, {pipeline_mode = #tpu.pipeline_mode<synchronous>, transform_indices = @transform_1, window_bounds = array<i64: 16, 8>}, {transform_indices = @transform_2, window_bounds = array<i64: 128, 8>}, {transform_indices = @transform_3, window_bounds = array<i64: 1, 1, 8>}, {transform_indices = @transform_4, window_bounds = array<i64: 1, 1, 8>}]} {
    %c0 = arith.constant 0 : index
    %c0_0 = arith.constant 0 : index
    %0 = vector.load %arg1[%c0, %c0_0] : memref<128x16xf32, #tpu.memory_space<vmem>>, vector<128x16xf32>
    %1 = arith.truncf %0 : vector<128x16xf32> to vector<128x16xbf16>
    %c0_1 = arith.constant 0 : index
    %c0_2 = arith.constant 0 : index
    %2 = vector.load %arg2[%c0_1, %c0_2] : memref<16x8xbf16, #tpu.memory_space<vmem>>, vector<16x8xbf16>
    %cst = arith.constant dense<0.000000e+00> : vector<128x8xf32>
    %3 = tpu.matmul %1, %2, %cst {dimension_numbers = #tpu.dot_dimension_numbers<[1], [0], [0], [1], [0, 0, 1, 1], [], []>} : vector<128x16xbf16>, vector<16x8xbf16>, vector<128x8xf32> -> vector<128x8xf32>
    %c0_3 = arith.constant 0 : index
    %c0_4 = arith.constant 0 : index
    %4 = vector.load %arg3[%c0_3, %c0_4] : memref<128x8xf32, #tpu.memory_space<vmem>>, vector<128x8xf32>
    tpu.vector_store %arg3[%c0_3, %c0_4], %3 {strides = array<i32>} : memref<128x8xf32, #tpu.memory_space<vmem>>, vector<128x8xf32>,
    %cst_5 = arith.constant dense<0.000000e+00> : vector<8xf32>
    %5 = vector.multi_reduction <add>, %3, %cst_5 [0] : vector<128x8xf32> to vector<8xf32>
    %6 = vector.shape_cast %5 : vector<8xf32> to vector<1x8xf32>
    %c0_6 = arith.constant 0 : index
    %c0_7 = arith.constant 0 : index
    %c0_8 = arith.constant 0 : index
    %7 = vector.load %arg4[%c0_6, %c0_7, %c0_8] : memref<1x1x8xf32, #tpu.memory_space<vmem>>, vector<1x1x8xf32>
    %8 = vector.shape_cast %7 : vector<1x1x8xf32> to vector<1x8xf32>
    %9 = vector.shape_cast %6 : vector<1x8xf32> to vector<1x1x8xf32>
    tpu.vector_store %arg4[%c0_6, %c0_7, %c0_8], %9 {strides = array<i32>} : memref<1x1x8xf32, #tpu.memory_space<vmem>>, vector<1x1x8xf32>,
    %10 = arith.mulf %3, %3 : vector<128x8xf32>
    %cst_9 = arith.constant dense<0.000000e+00> : vector<8xf32>
    %11 = vector.multi_reduction <add>, %10, %cst_9 [0] : vector<128x8xf32> to vector<8xf32>
    %12 = vector.shape_cast %11 : vector<8xf32> to vector<1x8xf32>
    %c0_10 = arith.constant 0 : index
    %c0_11 = arith.constant 0 : index
    %c0_12 = arith.constant 0 : index
    %13 = vector.load %arg5[%c0_10, %c0_11, %c0_12] : memref<1x1x8xf32, #tpu.memory_space<vmem>>, vector<1x1x8xf32>
    %14 = vector.shape_cast %13 : vector<1x1x8xf32> to vector<1x8xf32>
    %15 = vector.shape_cast %12 : vector<1x8xf32> to vector<1x1x8xf32>
    tpu.vector_store %arg5[%c0_10, %c0_11, %c0_12], %15 {strides = array<i32>} : memref<1x1x8xf32, #tpu.memory_space<vmem>>, vector<1x1x8xf32>,
    return
  }
  func.func @transform_0(%arg0: i32) -> (i32, i32) {
    %c0_i32 = arith.constant 0 : i32
    %c0_i32_0 = arith.constant 0 : i32
    return %arg0, %c0_i32 : i32, i32
  }
  func.func @transform_1(%arg0: i32) -> (i32, i32) {
    %c0_i32 = arith.constant 0 : i32
    %c0_i32_0 = arith.constant 0 : i32
    %c0_i32_1 = arith.constant 0 : i32
    return %c0_i32, %c0_i32_0 : i32, i32
  }
  func.func @transform_2(%arg0: i32) -> (i32, i32) {
    %c0_i32 = arith.constant 0 : i32
    %c0_i32_0 = arith.constant 0 : i32
    return %arg0, %c0_i32 : i32, i32
  }
  func.func @transform_3(%arg0: i32) -> (i32, i32, i32) {
    %c0_i32 = arith.constant 0 : i32
    %c0_i32_0 = arith.constant 0 : i32
    %c0_i32_1 = arith.constant 0 : i32
    return %arg0, %c0_i32, %c0_i32_0 : i32, i32, i32
  }
  func.func @transform_4(%arg0: i32) -> (i32, i32, i32) {
    %c0_i32 = arith.constant 0 : i32
    %c0_i32_0 = arith.constant 0 : i32
    %c0_i32_1 = arith.constant 0 : i32
    return %arg0, %c0_i32, %c0_i32_0 : i32, i32, i32
  }
}

module attributes {stable_mosaic.version = 11 : i64} {
  func.func @_conv3x3_kernel(%arg0: i32, %arg1: memref<1x8x8x16xf32, #tpu.memory_space<vmem>>, %arg2: memref<1x16xf32, #tpu.memory_space<vmem>>, %arg3: memref<1x16xf32, #tpu.memory_space<vmem>>, %arg4: memref<9x16x32xbf16, #tpu.memory_space<vmem>>, %arg5: memref<1x8x8x32xf32, #tpu.memory_space<vmem>>, %arg6: memref<1x1x32xf32, #tpu.memory_space<vmem>>, %arg7: memref<1x1x32xf32, #tpu.memory_space<vmem>>, %arg8: memref<10x10x16xf32, #tpu.memory_space<vmem>>) attributes {dimension_semantics = [#tpu.dimension_semantics<parallel>], iteration_bounds = array<i64: 2>, scalar_prefetch = 0 : i64, scratch_operands = 1 : i64, tpu.core_type = #tpu.core_type<tc>, window_params = [{transform_indices = @transform_0, window_bounds = array<i64: 1, 8, 8, 16>}, {pipeline_mode = #tpu.pipeline_mode<synchronous>, transform_indices = @transform_1, window_bounds = array<i64: 1, 16>}, {pipeline_mode = #tpu.pipeline_mode<synchronous>, transform_indices = @transform_2, window_bounds = array<i64: 1, 16>}, {pipeline_mode = #tpu.pipeline_mode<synchronous>, transform_indices = @transform_3, window_bounds = array<i64: 9, 16, 32>}, {transform_indices = @transform_4, window_bounds = array<i64: 1, 8, 8, 32>}, {transform_indices = @transform_5, window_bounds = array<i64: 1, 1, 32>}, {transform_indices = @transform_6, window_bounds = array<i64: 1, 1, 32>}]} {
    %c0 = arith.constant 0 : index
    %c0_0 = arith.constant 0 : index
    %c0_1 = arith.constant 0 : index
    %c0_2 = arith.constant 0 : index
    %0 = vector.load %arg1[%c0, %c0_0, %c0_1, %c0_2] : memref<1x8x8x16xf32, #tpu.memory_space<vmem>>, vector<1x8x8x16xf32>
    %1 = vector.shape_cast %0 : vector<1x8x8x16xf32> to vector<8x8x16xf32>
    %c0_3 = arith.constant 0 : index
    %c0_4 = arith.constant 0 : index
    %2 = vector.load %arg2[%c0_3, %c0_4] : memref<1x16xf32, #tpu.memory_space<vmem>>, vector<1x16xf32>
    %3 = vector.shape_cast %2 : vector<1x16xf32> to vector<1x1x16xf32>
    %4 = vector.broadcast %3 : vector<1x1x16xf32> to vector<8x8x16xf32>
    %5 = arith.mulf %1, %4 : vector<8x8x16xf32>
    %c0_5 = arith.constant 0 : index
    %c0_6 = arith.constant 0 : index
    %6 = vector.load %arg3[%c0_5, %c0_6] : memref<1x16xf32, #tpu.memory_space<vmem>>, vector<1x16xf32>
    %7 = vector.shape_cast %6 : vector<1x16xf32> to vector<1x1x16xf32>
    %8 = vector.broadcast %7 : vector<1x1x16xf32> to vector<8x8x16xf32>
    %9 = arith.addf %5, %8 : vector<8x8x16xf32>
    %cst = arith.constant 0.000000e+00 : f32
    %10 = vector.broadcast %cst : f32 to vector<8x8x16xf32>
    %11 = arith.maximumf %9, %10 : vector<8x8x16xf32>
    %cst_7 = arith.constant 0.000000e+00 : f32
    %12 = vector.broadcast %cst_7 : f32 to vector<10x10x16xf32>
    %c0_8 = arith.constant 0 : index
    %c0_9 = arith.constant 0 : index
    %c0_10 = arith.constant 0 : index
    %13 = vector.load %arg8[%c0_8, %c0_9, %c0_10] : memref<10x10x16xf32, #tpu.memory_space<vmem>>, vector<10x10x16xf32>
    tpu.vector_store %arg8[%c0_8, %c0_9, %c0_10], %12 {strides = array<i32>} : memref<10x10x16xf32, #tpu.memory_space<vmem>>, vector<10x10x16xf32>,
    %c1 = arith.constant 1 : index
    %c1_11 = arith.constant 1 : index
    %c0_12 = arith.constant 0 : index
    %14 = vector.load %arg8[%c1, %c1_11, %c0_12] : memref<10x10x16xf32, #tpu.memory_space<vmem>>, vector<8x8x16xf32>
    tpu.vector_store %arg8[%c1, %c1_11, %c0_12], %11 {strides = array<i32>} : memref<10x10x16xf32, #tpu.memory_space<vmem>>, vector<8x8x16xf32>,
    %cst_13 = arith.constant 0.000000e+00 : f32
    %15 = vector.broadcast %cst_13 : f32 to vector<64x32xf32>
    %c0_14 = arith.constant 0 : index
    %c0_15 = arith.constant 0 : index
    %c0_16 = arith.constant 0 : index
    %16 = vector.load %arg8[%c0_14, %c0_15, %c0_16] : memref<10x10x16xf32, #tpu.memory_space<vmem>>, vector<8x8x16xf32>
    %17 = vector.shape_cast %16 : vector<8x8x16xf32> to vector<64x16xf32>
    %18 = arith.truncf %17 : vector<64x16xf32> to vector<64x16xbf16>
    %c0_17 = arith.constant 0 : index
    %c0_18 = arith.constant 0 : index
    %c0_19 = arith.constant 0 : index
    %19 = vector.load %arg4[%c0_17, %c0_18, %c0_19] : memref<9x16x32xbf16, #tpu.memory_space<vmem>>, vector<1x16x32xbf16>
    %20 = vector.shape_cast %19 : vector<1x16x32xbf16> to vector<16x32xbf16>
    %cst_20 = arith.constant dense<0.000000e+00> : vector<64x32xf32>
    %21 = tpu.matmul %18, %20, %cst_20 {dimension_numbers = #tpu.dot_dimension_numbers<[1], [0], [0], [1], [0, 0, 1, 1], [], []>} : vector<64x16xbf16>, vector<16x32xbf16>, vector<64x32xf32> -> vector<64x32xf32>
    %22 = arith.addf %15, %21 : vector<64x32xf32>
    %c0_21 = arith.constant 0 : index
    %c1_22 = arith.constant 1 : index
    %c0_23 = arith.constant 0 : index
    %23 = vector.load %arg8[%c0_21, %c1_22, %c0_23] : memref<10x10x16xf32, #tpu.memory_space<vmem>>, vector<8x8x16xf32>
    %24 = vector.shape_cast %23 : vector<8x8x16xf32> to vector<64x16xf32>
    %25 = arith.truncf %24 : vector<64x16xf32> to vector<64x16xbf16>
    %c1_24 = arith.constant 1 : index
    %c0_25 = arith.constant 0 : index
    %c0_26 = arith.constant 0 : index
    %26 = vector.load %arg4[%c1_24, %c0_25, %c0_26] : memref<9x16x32xbf16, #tpu.memory_space<vmem>>, vector<1x16x32xbf16>
    %27 = vector.shape_cast %26 : vector<1x16x32xbf16> to vector<16x32xbf16>
    %cst_27 = arith.constant dense<0.000000e+00> : vector<64x32xf32>
    %28 = tpu.matmul %25, %27, %cst_27 {dimension_numbers = #tpu.dot_dimension_numbers<[1], [0], [0], [1], [0, 0, 1, 1], [], []>} : vector<64x16xbf16>, vector<16x32xbf16>, vector<64x32xf32> -> vector<64x32xf32>
    %29 = arith.addf %22, %28 : vector<64x32xf32>
    %c0_28 = arith.constant 0 : index
    %c2 = arith.constant 2 : index
    %c0_29 = arith.constant 0 : index
    %30 = vector.load %arg8[%c0_28, %c2, %c0_29] : memref<10x10x16xf32, #tpu.memory_space<vmem>>, vector<8x8x16xf32>
    %31 = vector.shape_cast %30 : vector<8x8x16xf32> to vector<64x16xf32>
    %32 = arith.truncf %31 : vector<64x16xf32> to vector<64x16xbf16>
    %c2_30 = arith.constant 2 : index
    %c0_31 = arith.constant 0 : index
    %c0_32 = arith.constant 0 : index
    %33 = vector.load %arg4[%c2_30, %c0_31, %c0_32] : memref<9x16x32xbf16, #tpu.memory_space<vmem>>, vector<1x16x32xbf16>
    %34 = vector.shape_cast %33 : vector<1x16x32xbf16> to vector<16x32xbf16>
    %cst_33 = arith.constant dense<0.000000e+00> : vector<64x32xf32>
    %35 = tpu.matmul %32, %34, %cst_33 {dimension_numbers = #tpu.dot_dimension_numbers<[1], [0], [0], [1], [0, 0, 1, 1], [], []>} : vector<64x16xbf16>, vector<16x32xbf16>, vector<64x32xf32> -> vector<64x32xf32>
    %36 = arith.addf %29, %35 : vector<64x32xf32>
    %c1_34 = arith.constant 1 : index
    %c0_35 = arith.constant 0 : index
    %c0_36 = arith.constant 0 : index
    %37 = vector.load %arg8[%c1_34, %c0_35, %c0_36] : memref<10x10x16xf32, #tpu.memory_space<vmem>>, vector<8x8x16xf32>
    %38 = vector.shape_cast %37 : vector<8x8x16xf32> to vector<64x16xf32>
    %39 = arith.truncf %38 : vector<64x16xf32> to vector<64x16xbf16>
    %c3 = arith.constant 3 : index
    %c0_37 = arith.constant 0 : index
    %c0_38 = arith.constant 0 : index
    %40 = vector.load %arg4[%c3, %c0_37, %c0_38] : memref<9x16x32xbf16, #tpu.memory_space<vmem>>, vector<1x16x32xbf16>
    %41 = vector.shape_cast %40 : vector<1x16x32xbf16> to vector<16x32xbf16>
    %cst_39 = arith.constant dense<0.000000e+00> : vector<64x32xf32>
    %42 = tpu.matmul %39, %41, %cst_39 {dimension_numbers = #tpu.dot_dimension_numbers<[1], [0], [0], [1], [0, 0, 1, 1], [], []>} : vector<64x16xbf16>, vector<16x32xbf16>, vector<64x32xf32> -> vector<64x32xf32>
    %43 = arith.addf %36, %42 : vector<64x32xf32>
    %c1_40 = arith.constant 1 : index
    %c1_41 = arith.constant 1 : index
    %c0_42 = arith.constant 0 : index
    %44 = vector.load %arg8[%c1_40, %c1_41, %c0_42] : memref<10x10x16xf32, #tpu.memory_space<vmem>>, vector<8x8x16xf32>
    %45 = vector.shape_cast %44 : vector<8x8x16xf32> to vector<64x16xf32>
    %46 = arith.truncf %45 : vector<64x16xf32> to vector<64x16xbf16>
    %c4 = arith.constant 4 : index
    %c0_43 = arith.constant 0 : index
    %c0_44 = arith.constant 0 : index
    %47 = vector.load %arg4[%c4, %c0_43, %c0_44] : memref<9x16x32xbf16, #tpu.memory_space<vmem>>, vector<1x16x32xbf16>
    %48 = vector.shape_cast %47 : vector<1x16x32xbf16> to vector<16x32xbf16>
    %cst_45 = arith.constant dense<0.000000e+00> : vector<64x32xf32>
    %49 = tpu.matmul %46, %48, %cst_45 {dimension_numbers = #tpu.dot_dimension_numbers<[1], [0], [0], [1], [0, 0, 1, 1], [], []>} : vector<64x16xbf16>, vector<16x32xbf16>, vector<64x32xf32> -> vector<64x32xf32>
    %50 = arith.addf %43, %49 : vector<64x32xf32>
    %c1_46 = arith.constant 1 : index
    %c2_47 = arith.constant 2 : index
    %c0_48 = arith.constant 0 : index
    %51 = vector.load %arg8[%c1_46, %c2_47, %c0_48] : memref<10x10x16xf32, #tpu.memory_space<vmem>>, vector<8x8x16xf32>
    %52 = vector.shape_cast %51 : vector<8x8x16xf32> to vector<64x16xf32>
    %53 = arith.truncf %52 : vector<64x16xf32> to vector<64x16xbf16>
    %c5 = arith.constant 5 : index
    %c0_49 = arith.constant 0 : index
    %c0_50 = arith.constant 0 : index
    %54 = vector.load %arg4[%c5, %c0_49, %c0_50] : memref<9x16x32xbf16, #tpu.memory_space<vmem>>, vector<1x16x32xbf16>
    %55 = vector.shape_cast %54 : vector<1x16x32xbf16> to vector<16x32xbf16>
    %cst_51 = arith.constant dense<0.000000e+00> : vector<64x32xf32>
    %56 = tpu.matmul %53, %55, %cst_51 {dimension_numbers = #tpu.dot_dimension_numbers<[1], [0], [0], [1], [0, 0, 1, 1], [], []>} : vector<64x16xbf16>, vector<16x32xbf16>, vector<64x32xf32> -> vector<64x32xf32>
    %57 = arith.addf %50, %56 : vector<64x32xf32>
    %c2_52 = arith.constant 2 : index
    %c0_53 = arith.constant 0 : index
    %c0_54 = arith.constant 0 : index
    %58 = vector.load %arg8[%c2_52, %c0_53, %c0_54] : memref<10x10x16xf32, #tpu.memory_space<vmem>>, vector<8x8x16xf32>
    %59 = vector.shape_cast %58 : vector<8x8x16xf32> to vector<64x16xf32>
    %60 = arith.truncf %59 : vector<64x16xf32> to vector<64x16xbf16>
    %c6 = arith.constant 6 : index
    %c0_55 = arith.constant 0 : index
    %c0_56 = arith.constant 0 : index
    %61 = vector.load %arg4[%c6, %c0_55, %c0_56] : memref<9x16x32xbf16, #tpu.memory_space<vmem>>, vector<1x16x32xbf16>
    %62 = vector.shape_cast %61 : vector<1x16x32xbf16> to vector<16x32xbf16>
    %cst_57 = arith.constant dense<0.000000e+00> : vector<64x32xf32>
    %63 = tpu.matmul %60, %62, %cst_57 {dimension_numbers = #tpu.dot_dimension_numbers<[1], [0], [0], [1], [0, 0, 1, 1], [], []>} : vector<64x16xbf16>, vector<16x32xbf16>, vector<64x32xf32> -> vector<64x32xf32>
    %64 = arith.addf %57, %63 : vector<64x32xf32>
    %c2_58 = arith.constant 2 : index
    %c1_59 = arith.constant 1 : index
    %c0_60 = arith.constant 0 : index
    %65 = vector.load %arg8[%c2_58, %c1_59, %c0_60] : memref<10x10x16xf32, #tpu.memory_space<vmem>>, vector<8x8x16xf32>
    %66 = vector.shape_cast %65 : vector<8x8x16xf32> to vector<64x16xf32>
    %67 = arith.truncf %66 : vector<64x16xf32> to vector<64x16xbf16>
    %c7 = arith.constant 7 : index
    %c0_61 = arith.constant 0 : index
    %c0_62 = arith.constant 0 : index
    %68 = vector.load %arg4[%c7, %c0_61, %c0_62] : memref<9x16x32xbf16, #tpu.memory_space<vmem>>, vector<1x16x32xbf16>
    %69 = vector.shape_cast %68 : vector<1x16x32xbf16> to vector<16x32xbf16>
    %cst_63 = arith.constant dense<0.000000e+00> : vector<64x32xf32>
    %70 = tpu.matmul %67, %69, %cst_63 {dimension_numbers = #tpu.dot_dimension_numbers<[1], [0], [0], [1], [0, 0, 1, 1], [], []>} : vector<64x16xbf16>, vector<16x32xbf16>, vector<64x32xf32> -> vector<64x32xf32>
    %71 = arith.addf %64, %70 : vector<64x32xf32>
    %c2_64 = arith.constant 2 : index
    %c2_65 = arith.constant 2 : index
    %c0_66 = arith.constant 0 : index
    %72 = vector.load %arg8[%c2_64, %c2_65, %c0_66] : memref<10x10x16xf32, #tpu.memory_space<vmem>>, vector<8x8x16xf32>
    %73 = vector.shape_cast %72 : vector<8x8x16xf32> to vector<64x16xf32>
    %74 = arith.truncf %73 : vector<64x16xf32> to vector<64x16xbf16>
    %c8 = arith.constant 8 : index
    %c0_67 = arith.constant 0 : index
    %c0_68 = arith.constant 0 : index
    %75 = vector.load %arg4[%c8, %c0_67, %c0_68] : memref<9x16x32xbf16, #tpu.memory_space<vmem>>, vector<1x16x32xbf16>
    %76 = vector.shape_cast %75 : vector<1x16x32xbf16> to vector<16x32xbf16>
    %cst_69 = arith.constant dense<0.000000e+00> : vector<64x32xf32>
    %77 = tpu.matmul %74, %76, %cst_69 {dimension_numbers = #tpu.dot_dimension_numbers<[1], [0], [0], [1], [0, 0, 1, 1], [], []>} : vector<64x16xbf16>, vector<16x32xbf16>, vector<64x32xf32> -> vector<64x32xf32>
    %78 = arith.addf %71, %77 : vector<64x32xf32>
    %79 = vector.shape_cast %78 : vector<64x32xf32> to vector<8x8x32xf32>
    %c0_70 = arith.constant 0 : index
    %c0_71 = arith.constant 0 : index
    %c0_72 = arith.constant 0 : index
    %c0_73 = arith.constant 0 : index
    %80 = vector.load %arg5[%c0_70, %c0_71, %c0_72, %c0_73] : memref<1x8x8x32xf32, #tpu.memory_space<vmem>>, vector<1x8x8x32xf32>
    %81 = vector.shape_cast %80 : vector<1x8x8x32xf32> to vector<8x8x32xf32>
    %82 = vector.shape_cast %79 : vector<8x8x32xf32> to vector<1x8x8x32xf32>
    tpu.vector_store %arg5[%c0_70, %c0_71, %c0_72, %c0_73], %82 {strides = array<i32>} : memref<1x8x8x32xf32, #tpu.memory_space<vmem>>, vector<1x8x8x32xf32>,
    %cst_74 = arith.constant dense<0.000000e+00> : vector<32xf32>
    %83 = vector.multi_reduction <add>, %78, %cst_74 [0] : vector<64x32xf32> to vector<32xf32>
    %84 = vector.shape_cast %83 : vector<32xf32> to vector<1x32xf32>
    %c0_75 = arith.constant 0 : index
    %c0_76 = arith.constant 0 : index
    %c0_77 = arith.constant 0 : index
    %85 = vector.load %arg6[%c0_75, %c0_76, %c0_77] : memref<1x1x32xf32, #tpu.memory_space<vmem>>, vector<1x1x32xf32>
    %86 = vector.shape_cast %85 : vector<1x1x32xf32> to vector<1x32xf32>
    %87 = vector.shape_cast %84 : vector<1x32xf32> to vector<1x1x32xf32>
    tpu.vector_store %arg6[%c0_75, %c0_76, %c0_77], %87 {strides = array<i32>} : memref<1x1x32xf32, #tpu.memory_space<vmem>>, vector<1x1x32xf32>,
    %88 = arith.mulf %78, %78 : vector<64x32xf32>
    %cst_78 = arith.constant dense<0.000000e+00> : vector<32xf32>
    %89 = vector.multi_reduction <add>, %88, %cst_78 [0] : vector<64x32xf32> to vector<32xf32>
    %90 = vector.shape_cast %89 : vector<32xf32> to vector<1x32xf32>
    %c0_79 = arith.constant 0 : index
    %c0_80 = arith.constant 0 : index
    %c0_81 = arith.constant 0 : index
    %91 = vector.load %arg7[%c0_79, %c0_80, %c0_81] : memref<1x1x32xf32, #tpu.memory_space<vmem>>, vector<1x1x32xf32>
    %92 = vector.shape_cast %91 : vector<1x1x32xf32> to vector<1x32xf32>
    %93 = vector.shape_cast %90 : vector<1x32xf32> to vector<1x1x32xf32>
    tpu.vector_store %arg7[%c0_79, %c0_80, %c0_81], %93 {strides = array<i32>} : memref<1x1x32xf32, #tpu.memory_space<vmem>>, vector<1x1x32xf32>,
    return
  }
  func.func @transform_0(%arg0: i32) -> (i32, i32, i32, i32) {
    %c0_i32 = arith.constant 0 : i32
    %c0_i32_0 = arith.constant 0 : i32
    %c0_i32_1 = arith.constant 0 : i32
    %c0_i32_2 = arith.constant 0 : i32
    return %arg0, %c0_i32, %c0_i32_0, %c0_i32_1 : i32, i32, i32, i32
  }
  func.func @transform_1(%arg0: i32) -> (i32, i32) {
    %c0_i32 = arith.constant 0 : i32
    %c0_i32_0 = arith.constant 0 : i32
    %c0_i32_1 = arith.constant 0 : i32
    return %c0_i32, %c0_i32_0 : i32, i32
  }
  func.func @transform_2(%arg0: i32) -> (i32, i32) {
    %c0_i32 = arith.constant 0 : i32
    %c0_i32_0 = arith.constant 0 : i32
    %c0_i32_1 = arith.constant 0 : i32
    return %c0_i32, %c0_i32_0 : i32, i32
  }
  func.func @transform_3(%arg0: i32) -> (i32, i32, i32) {
    %c0_i32 = arith.constant 0 : i32
    %c0_i32_0 = arith.constant 0 : i32
    %c0_i32_1 = arith.constant 0 : i32
    %c0_i32_2 = arith.constant 0 : i32
    return %c0_i32, %c0_i32_0, %c0_i32_1 : i32, i32, i32
  }
  func.func @transform_4(%arg0: i32) -> (i32, i32, i32, i32) {
    %c0_i32 = arith.constant 0 : i32
    %c0_i32_0 = arith.constant 0 : i32
    %c0_i32_1 = arith.constant 0 : i32
    %c0_i32_2 = arith.constant 0 : i32
    return %arg0, %c0_i32, %c0_i32_0, %c0_i32_1 : i32, i32, i32, i32
  }
  func.func @transform_5(%arg0: i32) -> (i32, i32, i32) {
    %c0_i32 = arith.constant 0 : i32
    %c0_i32_0 = arith.constant 0 : i32
    %c0_i32_1 = arith.constant 0 : i32
    return %arg0, %c0_i32, %c0_i32_0 : i32, i32, i32
  }
  func.func @transform_6(%arg0: i32) -> (i32, i32, i32) {
    %c0_i32 = arith.constant 0 : i32
    %c0_i32_0 = arith.constant 0 : i32
    %c0_i32_1 = arith.constant 0 : i32
    return %arg0, %c0_i32, %c0_i32_0 : i32, i32, i32
  }
}

module attributes {stable_mosaic.version = 11 : i64} {
  func.func @_conv3x3_kernel(%arg0: i32, %arg1: memref<1x8x8x8xf32, #tpu.memory_space<vmem>>, %arg2: memref<1x8xf32, #tpu.memory_space<vmem>>, %arg3: memref<1x8xf32, #tpu.memory_space<vmem>>, %arg4: memref<9x8x16xbf16, #tpu.memory_space<vmem>>, %arg5: memref<1x8x8x16xf32, #tpu.memory_space<vmem>>, %arg6: memref<1x1x16xf32, #tpu.memory_space<vmem>>, %arg7: memref<1x1x16xf32, #tpu.memory_space<vmem>>, %arg8: memref<10x10x8xf32, #tpu.memory_space<vmem>>) attributes {dimension_semantics = [#tpu.dimension_semantics<parallel>], iteration_bounds = array<i64: 2>, scalar_prefetch = 0 : i64, scratch_operands = 1 : i64, tpu.core_type = #tpu.core_type<tc>, window_params = [{transform_indices = @transform_0, window_bounds = array<i64: 1, 8, 8, 8>}, {pipeline_mode = #tpu.pipeline_mode<synchronous>, transform_indices = @transform_1, window_bounds = array<i64: 1, 8>}, {pipeline_mode = #tpu.pipeline_mode<synchronous>, transform_indices = @transform_2, window_bounds = array<i64: 1, 8>}, {pipeline_mode = #tpu.pipeline_mode<synchronous>, transform_indices = @transform_3, window_bounds = array<i64: 9, 8, 16>}, {transform_indices = @transform_4, window_bounds = array<i64: 1, 8, 8, 16>}, {transform_indices = @transform_5, window_bounds = array<i64: 1, 1, 16>}, {transform_indices = @transform_6, window_bounds = array<i64: 1, 1, 16>}]} {
    %c0 = arith.constant 0 : index
    %c0_0 = arith.constant 0 : index
    %c0_1 = arith.constant 0 : index
    %c0_2 = arith.constant 0 : index
    %0 = vector.load %arg1[%c0, %c0_0, %c0_1, %c0_2] : memref<1x8x8x8xf32, #tpu.memory_space<vmem>>, vector<1x8x8x8xf32>
    %1 = vector.shape_cast %0 : vector<1x8x8x8xf32> to vector<8x8x8xf32>
    %c0_3 = arith.constant 0 : index
    %c0_4 = arith.constant 0 : index
    %2 = vector.load %arg2[%c0_3, %c0_4] : memref<1x8xf32, #tpu.memory_space<vmem>>, vector<1x8xf32>
    %3 = vector.shape_cast %2 : vector<1x8xf32> to vector<1x1x8xf32>
    %4 = vector.broadcast %3 : vector<1x1x8xf32> to vector<8x8x8xf32>
    %5 = arith.mulf %1, %4 : vector<8x8x8xf32>
    %c0_5 = arith.constant 0 : index
    %c0_6 = arith.constant 0 : index
    %6 = vector.load %arg3[%c0_5, %c0_6] : memref<1x8xf32, #tpu.memory_space<vmem>>, vector<1x8xf32>
    %7 = vector.shape_cast %6 : vector<1x8xf32> to vector<1x1x8xf32>
    %8 = vector.broadcast %7 : vector<1x1x8xf32> to vector<8x8x8xf32>
    %9 = arith.addf %5, %8 : vector<8x8x8xf32>
    %cst = arith.constant 0.000000e+00 : f32
    %10 = vector.broadcast %cst : f32 to vector<10x10x8xf32>
    %c0_7 = arith.constant 0 : index
    %c0_8 = arith.constant 0 : index
    %c0_9 = arith.constant 0 : index
    %11 = vector.load %arg8[%c0_7, %c0_8, %c0_9] : memref<10x10x8xf32, #tpu.memory_space<vmem>>, vector<10x10x8xf32>
    tpu.vector_store %arg8[%c0_7, %c0_8, %c0_9], %10 {strides = array<i32>} : memref<10x10x8xf32, #tpu.memory_space<vmem>>, vector<10x10x8xf32>,
    %c1 = arith.constant 1 : index
    %c1_10 = arith.constant 1 : index
    %c0_11 = arith.constant 0 : index
    %12 = vector.load %arg8[%c1, %c1_10, %c0_11] : memref<10x10x8xf32, #tpu.memory_space<vmem>>, vector<8x8x8xf32>
    tpu.vector_store %arg8[%c1, %c1_10, %c0_11], %9 {strides = array<i32>} : memref<10x10x8xf32, #tpu.memory_space<vmem>>, vector<8x8x8xf32>,
    %cst_12 = arith.constant 0.000000e+00 : f32
    %13 = vector.broadcast %cst_12 : f32 to vector<64x16xf32>
    %c0_13 = arith.constant 0 : index
    %c0_14 = arith.constant 0 : index
    %c0_15 = arith.constant 0 : index
    %14 = vector.load %arg8[%c0_13, %c0_14, %c0_15] : memref<10x10x8xf32, #tpu.memory_space<vmem>>, vector<8x8x8xf32>
    %15 = vector.shape_cast %14 : vector<8x8x8xf32> to vector<64x8xf32>
    %16 = arith.truncf %15 : vector<64x8xf32> to vector<64x8xbf16>
    %c0_16 = arith.constant 0 : index
    %c0_17 = arith.constant 0 : index
    %c0_18 = arith.constant 0 : index
    %17 = vector.load %arg4[%c0_16, %c0_17, %c0_18] : memref<9x8x16xbf16, #tpu.memory_space<vmem>>, vector<1x8x16xbf16>
    %18 = vector.shape_cast %17 : vector<1x8x16xbf16> to vector<8x16xbf16>
    %cst_19 = arith.constant dense<0.000000e+00> : vector<64x16xf32>
    %19 = tpu.matmul %16, %18, %cst_19 {dimension_numbers = #tpu.dot_dimension_numbers<[1], [0], [0], [1], [0, 0, 1, 1], [], []>} : vector<64x8xbf16>, vector<8x16xbf16>, vector<64x16xf32> -> vector<64x16xf32>
    %20 = arith.addf %13, %19 : vector<64x16xf32>
    %c0_20 = arith.constant 0 : index
    %c1_21 = arith.constant 1 : index
    %c0_22 = arith.constant 0 : index
    %21 = vector.load %arg8[%c0_20, %c1_21, %c0_22] : memref<10x10x8xf32, #tpu.memory_space<vmem>>, vector<8x8x8xf32>
    %22 = vector.shape_cast %21 : vector<8x8x8xf32> to vector<64x8xf32>
    %23 = arith.truncf %22 : vector<64x8xf32> to vector<64x8xbf16>
    %c1_23 = arith.constant 1 : index
    %c0_24 = arith.constant 0 : index
    %c0_25 = arith.constant 0 : index
    %24 = vector.load %arg4[%c1_23, %c0_24, %c0_25] : memref<9x8x16xbf16, #tpu.memory_space<vmem>>, vector<1x8x16xbf16>
    %25 = vector.shape_cast %24 : vector<1x8x16xbf16> to vector<8x16xbf16>
    %cst_26 = arith.constant dense<0.000000e+00> : vector<64x16xf32>
    %26 = tpu.matmul %23, %25, %cst_26 {dimension_numbers = #tpu.dot_dimension_numbers<[1], [0], [0], [1], [0, 0, 1, 1], [], []>} : vector<64x8xbf16>, vector<8x16xbf16>, vector<64x16xf32> -> vector<64x16xf32>
    %27 = arith.addf %20, %26 : vector<64x16xf32>
    %c0_27 = arith.constant 0 : index
    %c2 = arith.constant 2 : index
    %c0_28 = arith.constant 0 : index
    %28 = vector.load %arg8[%c0_27, %c2, %c0_28] : memref<10x10x8xf32, #tpu.memory_space<vmem>>, vector<8x8x8xf32>
    %29 = vector.shape_cast %28 : vector<8x8x8xf32> to vector<64x8xf32>
    %30 = arith.truncf %29 : vector<64x8xf32> to vector<64x8xbf16>
    %c2_29 = arith.constant 2 : index
    %c0_30 = arith.constant 0 : index
    %c0_31 = arith.constant 0 : index
    %31 = vector.load %arg4[%c2_29, %c0_30, %c0_31] : memref<9x8x16xbf16, #tpu.memory_space<vmem>>, vector<1x8x16xbf16>
    %32 = vector.shape_cast %31 : vector<1x8x16xbf16> to vector<8x16xbf16>
    %cst_32 = arith.constant dense<0.000000e+00> : vector<64x16xf32>
    %33 = tpu.matmul %30, %32, %cst_32 {dimension_numbers = #tpu.dot_dimension_numbers<[1], [0], [0], [1], [0, 0, 1, 1], [], []>} : vector<64x8xbf16>, vector<8x16xbf16>, vector<64x16xf32> -> vector<64x16xf32>
    %34 = arith.addf %27, %33 : vector<64x16xf32>
    %c1_33 = arith.constant 1 : index
    %c0_34 = arith.constant 0 : index
    %c0_35 = arith.constant 0 : index
    %35 = vector.load %arg8[%c1_33, %c0_34, %c0_35] : memref<10x10x8xf32, #tpu.memory_space<vmem>>, vector<8x8x8xf32>
    %36 = vector.shape_cast %35 : vector<8x8x8xf32> to vector<64x8xf32>
    %37 = arith.truncf %36 : vector<64x8xf32> to vector<64x8xbf16>
    %c3 = arith.constant 3 : index
    %c0_36 = arith.constant 0 : index
    %c0_37 = arith.constant 0 : index
    %38 = vector.load %arg4[%c3, %c0_36, %c0_37] : memref<9x8x16xbf16, #tpu.memory_space<vmem>>, vector<1x8x16xbf16>
    %39 = vector.shape_cast %38 : vector<1x8x16xbf16> to vector<8x16xbf16>
    %cst_38 = arith.constant dense<0.000000e+00> : vector<64x16xf32>
    %40 = tpu.matmul %37, %39, %cst_38 {dimension_numbers = #tpu.dot_dimension_numbers<[1], [0], [0], [1], [0, 0, 1, 1], [], []>} : vector<64x8xbf16>, vector<8x16xbf16>, vector<64x16xf32> -> vector<64x16xf32>
    %41 = arith.addf %34, %40 : vector<64x16xf32>
    %c1_39 = arith.constant 1 : index
    %c1_40 = arith.constant 1 : index
    %c0_41 = arith.constant 0 : index
    %42 = vector.load %arg8[%c1_39, %c1_40, %c0_41] : memref<10x10x8xf32, #tpu.memory_space<vmem>>, vector<8x8x8xf32>
    %43 = vector.shape_cast %42 : vector<8x8x8xf32> to vector<64x8xf32>
    %44 = arith.truncf %43 : vector<64x8xf32> to vector<64x8xbf16>
    %c4 = arith.constant 4 : index
    %c0_42 = arith.constant 0 : index
    %c0_43 = arith.constant 0 : index
    %45 = vector.load %arg4[%c4, %c0_42, %c0_43] : memref<9x8x16xbf16, #tpu.memory_space<vmem>>, vector<1x8x16xbf16>
    %46 = vector.shape_cast %45 : vector<1x8x16xbf16> to vector<8x16xbf16>
    %cst_44 = arith.constant dense<0.000000e+00> : vector<64x16xf32>
    %47 = tpu.matmul %44, %46, %cst_44 {dimension_numbers = #tpu.dot_dimension_numbers<[1], [0], [0], [1], [0, 0, 1, 1], [], []>} : vector<64x8xbf16>, vector<8x16xbf16>, vector<64x16xf32> -> vector<64x16xf32>
    %48 = arith.addf %41, %47 : vector<64x16xf32>
    %c1_45 = arith.constant 1 : index
    %c2_46 = arith.constant 2 : index
    %c0_47 = arith.constant 0 : index
    %49 = vector.load %arg8[%c1_45, %c2_46, %c0_47] : memref<10x10x8xf32, #tpu.memory_space<vmem>>, vector<8x8x8xf32>
    %50 = vector.shape_cast %49 : vector<8x8x8xf32> to vector<64x8xf32>
    %51 = arith.truncf %50 : vector<64x8xf32> to vector<64x8xbf16>
    %c5 = arith.constant 5 : index
    %c0_48 = arith.constant 0 : index
    %c0_49 = arith.constant 0 : index
    %52 = vector.load %arg4[%c5, %c0_48, %c0_49] : memref<9x8x16xbf16, #tpu.memory_space<vmem>>, vector<1x8x16xbf16>
    %53 = vector.shape_cast %52 : vector<1x8x16xbf16> to vector<8x16xbf16>
    %cst_50 = arith.constant dense<0.000000e+00> : vector<64x16xf32>
    %54 = tpu.matmul %51, %53, %cst_50 {dimension_numbers = #tpu.dot_dimension_numbers<[1], [0], [0], [1], [0, 0, 1, 1], [], []>} : vector<64x8xbf16>, vector<8x16xbf16>, vector<64x16xf32> -> vector<64x16xf32>
    %55 = arith.addf %48, %54 : vector<64x16xf32>
    %c2_51 = arith.constant 2 : index
    %c0_52 = arith.constant 0 : index
    %c0_53 = arith.constant 0 : index
    %56 = vector.load %arg8[%c2_51, %c0_52, %c0_53] : memref<10x10x8xf32, #tpu.memory_space<vmem>>, vector<8x8x8xf32>
    %57 = vector.shape_cast %56 : vector<8x8x8xf32> to vector<64x8xf32>
    %58 = arith.truncf %57 : vector<64x8xf32> to vector<64x8xbf16>
    %c6 = arith.constant 6 : index
    %c0_54 = arith.constant 0 : index
    %c0_55 = arith.constant 0 : index
    %59 = vector.load %arg4[%c6, %c0_54, %c0_55] : memref<9x8x16xbf16, #tpu.memory_space<vmem>>, vector<1x8x16xbf16>
    %60 = vector.shape_cast %59 : vector<1x8x16xbf16> to vector<8x16xbf16>
    %cst_56 = arith.constant dense<0.000000e+00> : vector<64x16xf32>
    %61 = tpu.matmul %58, %60, %cst_56 {dimension_numbers = #tpu.dot_dimension_numbers<[1], [0], [0], [1], [0, 0, 1, 1], [], []>} : vector<64x8xbf16>, vector<8x16xbf16>, vector<64x16xf32> -> vector<64x16xf32>
    %62 = arith.addf %55, %61 : vector<64x16xf32>
    %c2_57 = arith.constant 2 : index
    %c1_58 = arith.constant 1 : index
    %c0_59 = arith.constant 0 : index
    %63 = vector.load %arg8[%c2_57, %c1_58, %c0_59] : memref<10x10x8xf32, #tpu.memory_space<vmem>>, vector<8x8x8xf32>
    %64 = vector.shape_cast %63 : vector<8x8x8xf32> to vector<64x8xf32>
    %65 = arith.truncf %64 : vector<64x8xf32> to vector<64x8xbf16>
    %c7 = arith.constant 7 : index
    %c0_60 = arith.constant 0 : index
    %c0_61 = arith.constant 0 : index
    %66 = vector.load %arg4[%c7, %c0_60, %c0_61] : memref<9x8x16xbf16, #tpu.memory_space<vmem>>, vector<1x8x16xbf16>
    %67 = vector.shape_cast %66 : vector<1x8x16xbf16> to vector<8x16xbf16>
    %cst_62 = arith.constant dense<0.000000e+00> : vector<64x16xf32>
    %68 = tpu.matmul %65, %67, %cst_62 {dimension_numbers = #tpu.dot_dimension_numbers<[1], [0], [0], [1], [0, 0, 1, 1], [], []>} : vector<64x8xbf16>, vector<8x16xbf16>, vector<64x16xf32> -> vector<64x16xf32>
    %69 = arith.addf %62, %68 : vector<64x16xf32>
    %c2_63 = arith.constant 2 : index
    %c2_64 = arith.constant 2 : index
    %c0_65 = arith.constant 0 : index
    %70 = vector.load %arg8[%c2_63, %c2_64, %c0_65] : memref<10x10x8xf32, #tpu.memory_space<vmem>>, vector<8x8x8xf32>
    %71 = vector.shape_cast %70 : vector<8x8x8xf32> to vector<64x8xf32>
    %72 = arith.truncf %71 : vector<64x8xf32> to vector<64x8xbf16>
    %c8 = arith.constant 8 : index
    %c0_66 = arith.constant 0 : index
    %c0_67 = arith.constant 0 : index
    %73 = vector.load %arg4[%c8, %c0_66, %c0_67] : memref<9x8x16xbf16, #tpu.memory_space<vmem>>, vector<1x8x16xbf16>
    %74 = vector.shape_cast %73 : vector<1x8x16xbf16> to vector<8x16xbf16>
    %cst_68 = arith.constant dense<0.000000e+00> : vector<64x16xf32>
    %75 = tpu.matmul %72, %74, %cst_68 {dimension_numbers = #tpu.dot_dimension_numbers<[1], [0], [0], [1], [0, 0, 1, 1], [], []>} : vector<64x8xbf16>, vector<8x16xbf16>, vector<64x16xf32> -> vector<64x16xf32>
    %76 = arith.addf %69, %75 : vector<64x16xf32>
    %77 = vector.shape_cast %76 : vector<64x16xf32> to vector<8x8x16xf32>
    %c0_69 = arith.constant 0 : index
    %c0_70 = arith.constant 0 : index
    %c0_71 = arith.constant 0 : index
    %c0_72 = arith.constant 0 : index
    %78 = vector.load %arg5[%c0_69, %c0_70, %c0_71, %c0_72] : memref<1x8x8x16xf32, #tpu.memory_space<vmem>>, vector<1x8x8x16xf32>
    %79 = vector.shape_cast %78 : vector<1x8x8x16xf32> to vector<8x8x16xf32>
    %80 = vector.shape_cast %77 : vector<8x8x16xf32> to vector<1x8x8x16xf32>
    tpu.vector_store %arg5[%c0_69, %c0_70, %c0_71, %c0_72], %80 {strides = array<i32>} : memref<1x8x8x16xf32, #tpu.memory_space<vmem>>, vector<1x8x8x16xf32>,
    %cst_73 = arith.constant dense<0.000000e+00> : vector<16xf32>
    %81 = vector.multi_reduction <add>, %76, %cst_73 [0] : vector<64x16xf32> to vector<16xf32>
    %82 = vector.shape_cast %81 : vector<16xf32> to vector<1x16xf32>
    %c0_74 = arith.constant 0 : index
    %c0_75 = arith.constant 0 : index
    %c0_76 = arith.constant 0 : index
    %83 = vector.load %arg6[%c0_74, %c0_75, %c0_76] : memref<1x1x16xf32, #tpu.memory_space<vmem>>, vector<1x1x16xf32>
    %84 = vector.shape_cast %83 : vector<1x1x16xf32> to vector<1x16xf32>
    %85 = vector.shape_cast %82 : vector<1x16xf32> to vector<1x1x16xf32>
    tpu.vector_store %arg6[%c0_74, %c0_75, %c0_76], %85 {strides = array<i32>} : memref<1x1x16xf32, #tpu.memory_space<vmem>>, vector<1x1x16xf32>,
    %86 = arith.mulf %76, %76 : vector<64x16xf32>
    %cst_77 = arith.constant dense<0.000000e+00> : vector<16xf32>
    %87 = vector.multi_reduction <add>, %86, %cst_77 [0] : vector<64x16xf32> to vector<16xf32>
    %88 = vector.shape_cast %87 : vector<16xf32> to vector<1x16xf32>
    %c0_78 = arith.constant 0 : index
    %c0_79 = arith.constant 0 : index
    %c0_80 = arith.constant 0 : index
    %89 = vector.load %arg7[%c0_78, %c0_79, %c0_80] : memref<1x1x16xf32, #tpu.memory_space<vmem>>, vector<1x1x16xf32>
    %90 = vector.shape_cast %89 : vector<1x1x16xf32> to vector<1x16xf32>
    %91 = vector.shape_cast %88 : vector<1x16xf32> to vector<1x1x16xf32>
    tpu.vector_store %arg7[%c0_78, %c0_79, %c0_80], %91 {strides = array<i32>} : memref<1x1x16xf32, #tpu.memory_space<vmem>>, vector<1x1x16xf32>,
    return
  }
  func.func @transform_0(%arg0: i32) -> (i32, i32, i32, i32) {
    %c0_i32 = arith.constant 0 : i32
    %c0_i32_0 = arith.constant 0 : i32
    %c0_i32_1 = arith.constant 0 : i32
    %c0_i32_2 = arith.constant 0 : i32
    return %arg0, %c0_i32, %c0_i32_0, %c0_i32_1 : i32, i32, i32, i32
  }
  func.func @transform_1(%arg0: i32) -> (i32, i32) {
    %c0_i32 = arith.constant 0 : i32
    %c0_i32_0 = arith.constant 0 : i32
    %c0_i32_1 = arith.constant 0 : i32
    return %c0_i32, %c0_i32_0 : i32, i32
  }
  func.func @transform_2(%arg0: i32) -> (i32, i32) {
    %c0_i32 = arith.constant 0 : i32
    %c0_i32_0 = arith.constant 0 : i32
    %c0_i32_1 = arith.constant 0 : i32
    return %c0_i32, %c0_i32_0 : i32, i32
  }
  func.func @transform_3(%arg0: i32) -> (i32, i32, i32) {
    %c0_i32 = arith.constant 0 : i32
    %c0_i32_0 = arith.constant 0 : i32
    %c0_i32_1 = arith.constant 0 : i32
    %c0_i32_2 = arith.constant 0 : i32
    return %c0_i32, %c0_i32_0, %c0_i32_1 : i32, i32, i32
  }
  func.func @transform_4(%arg0: i32) -> (i32, i32, i32, i32) {
    %c0_i32 = arith.constant 0 : i32
    %c0_i32_0 = arith.constant 0 : i32
    %c0_i32_1 = arith.constant 0 : i32
    %c0_i32_2 = arith.constant 0 : i32
    return %arg0, %c0_i32, %c0_i32_0, %c0_i32_1 : i32, i32, i32, i32
  }
  func.func @transform_5(%arg0: i32) -> (i32, i32, i32) {
    %c0_i32 = arith.constant 0 : i32
    %c0_i32_0 = arith.constant 0 : i32
    %c0_i32_1 = arith.constant 0 : i32
    return %arg0, %c0_i32, %c0_i32_0 : i32, i32, i32
  }
  func.func @transform_6(%arg0: i32) -> (i32, i32, i32) {
    %c0_i32 = arith.constant 0 : i32
    %c0_i32_0 = arith.constant 0 : i32
    %c0_i32_1 = arith.constant 0 : i32
    return %arg0, %c0_i32, %c0_i32_0 : i32, i32, i32
  }
}

module attributes {stable_mosaic.version = 11 : i64} {
  func.func @_affine_kernel(%arg0: i32, %arg1: memref<32x128xf32, #tpu.memory_space<vmem>>, %arg2: memref<1x128xf32, #tpu.memory_space<vmem>>, %arg3: memref<1x128xf32, #tpu.memory_space<vmem>>, %arg4: memref<32x128xf32, #tpu.memory_space<vmem>>) attributes {dimension_semantics = [#tpu.dimension_semantics<parallel>], iteration_bounds = array<i64: 1>, scalar_prefetch = 0 : i64, scratch_operands = 0 : i64, tpu.core_type = #tpu.core_type<tc>, window_params = [{transform_indices = @transform_0, window_bounds = array<i64: 32, 128>}, {pipeline_mode = #tpu.pipeline_mode<synchronous>, transform_indices = @transform_1, window_bounds = array<i64: 1, 128>}, {pipeline_mode = #tpu.pipeline_mode<synchronous>, transform_indices = @transform_2, window_bounds = array<i64: 1, 128>}, {transform_indices = @transform_3, window_bounds = array<i64: 32, 128>}]} {
    %c0 = arith.constant 0 : index
    %c0_0 = arith.constant 0 : index
    %0 = vector.load %arg1[%c0, %c0_0] : memref<32x128xf32, #tpu.memory_space<vmem>>, vector<32x128xf32>
    %c0_1 = arith.constant 0 : index
    %c0_2 = arith.constant 0 : index
    %1 = vector.load %arg2[%c0_1, %c0_2] : memref<1x128xf32, #tpu.memory_space<vmem>>, vector<1x128xf32>
    %2 = vector.broadcast %1 : vector<1x128xf32> to vector<32x128xf32>
    %3 = arith.mulf %0, %2 : vector<32x128xf32>
    %c0_3 = arith.constant 0 : index
    %c0_4 = arith.constant 0 : index
    %4 = vector.load %arg3[%c0_3, %c0_4] : memref<1x128xf32, #tpu.memory_space<vmem>>, vector<1x128xf32>
    %5 = vector.broadcast %4 : vector<1x128xf32> to vector<32x128xf32>
    %6 = arith.addf %3, %5 : vector<32x128xf32>
    %cst = arith.constant 0.000000e+00 : f32
    %7 = vector.broadcast %cst : f32 to vector<32x128xf32>
    %8 = arith.maximumf %6, %7 : vector<32x128xf32>
    %c0_5 = arith.constant 0 : index
    %c0_6 = arith.constant 0 : index
    %9 = vector.load %arg4[%c0_5, %c0_6] : memref<32x128xf32, #tpu.memory_space<vmem>>, vector<32x128xf32>
    tpu.vector_store %arg4[%c0_5, %c0_6], %8 {strides = array<i32>} : memref<32x128xf32, #tpu.memory_space<vmem>>, vector<32x128xf32>,
    return
  }
  func.func @transform_0(%arg0: i32) -> (i32, i32) {
    %c0_i32 = arith.constant 0 : i32
    %c0_i32_0 = arith.constant 0 : i32
    return %arg0, %c0_i32 : i32, i32
  }
  func.func @transform_1(%arg0: i32) -> (i32, i32) {
    %c0_i32 = arith.constant 0 : i32
    %c0_i32_0 = arith.constant 0 : i32
    %c0_i32_1 = arith.constant 0 : i32
    return %c0_i32, %c0_i32_0 : i32, i32
  }
  func.func @transform_2(%arg0: i32) -> (i32, i32) {
    %c0_i32 = arith.constant 0 : i32
    %c0_i32_0 = arith.constant 0 : i32
    %c0_i32_1 = arith.constant 0 : i32
    return %c0_i32, %c0_i32_0 : i32, i32
  }
  func.func @transform_3(%arg0: i32) -> (i32, i32) {
    %c0_i32 = arith.constant 0 : i32
    %c0_i32_0 = arith.constant 0 : i32
    return %arg0, %c0_i32 : i32, i32
  }
}

</mosaic_0001>

<bundles_post_ra>
// kernel: down_forward.4
= control target key start
LH: loop header
LB: loop body
LE: loop exit
PB: predicated region body
PF: predicated region fallthrough
CT: control target
= control target key end

     0   :  { %vm47_vm0 = vcmask 130048   ;;  %vm169_vm1 = vcmask 64512   ;;  %vm223_vm2 = vcmask 57344   ;;  %s528_s1 = inlined_call_operand.vmem [shape: bf16[16,8], index: 1, kind: input, shape index: {}]   ;;  %s529_s0 = inlined_call_operand.vmem [shape: f32[128,16], index: 0, kind: input, shape index: {}]   ;;  %s530_s2 = inlined_call_operand.vmem [shape: f32[128,8], index: 2, kind: output, shape index: {0}]   ;;  %s531_s3 = inlined_call_operand.vmem [shape: f32[1,1,8], index: 3, kind: output, shape index: {1}]   ;;  %s532_s4 = inlined_call_operand.vmem [shape: f32[1,1,8], index: 4, kind: output, shape index: {2}]  }
   0x1   :  { %v329_v0 = vld [vmem:[%s528_s1] sm:$0xff]   ;;  %v16_v2 = vld [vmem:[%s529_s0 + $0x8] sm:$0xff]  ;;  %v17_v3 = vld [vmem:[%s529_s0 + $0x10] sm:$0xff] }
   0x2   :  { %v15_v1 = vld [vmem:[%s529_s0] sm:$0xff]  ;;  %309 = vmatprep.subr.bf16.mxu0 %v329_v0  ;;  %v18_v5 = vld [vmem:[%s529_s0 + $0x18] sm:$0xff]  ;;  %v20_v7 = vld [vmem:[%s529_s0 + $0x28] sm:$0xff]  ;;  %327 = vmatprep.subr.bf16.mxu1 %v329_v0 }
   0x3   :  { %v31_v4 = vpack.c.bf16 %v16_v2, %v15_v1  ;;  %v19_v6 = vld [vmem:[%s529_s0 + $0x20] sm:$0xff]  ;;  %310 = vmatpush3.bf16.msra.mxu0 %v329_v0  ;;  %v32_v8 = vpack.c.bf16 %v18_v5, %v17_v3  ;;  %328 = vmatpush3.bf16.msra.mxu1 %v329_v0  ;;  %v24_v11 = vld [vmem:[%s529_s0 + $0x48] sm:$0xff]  ;;  %v25_v12 = vld [vmem:[%s529_s0 + $0x50] sm:$0xff] }
   0x4   :  { %v33_v9 = vpack.c.bf16 %v20_v7, %v19_v6  ;;  %v23_v10 = vld [vmem:[%s529_s0 + $0x40] sm:$0xff]  ;;  %v26_v13 = vld [vmem:[%s529_s0 + $0x58] sm:$0xff]  ;;  %v28_v17 = vld [vmem:[%s529_s0 + $0x68] sm:$0xff] }
   0x5   :  { %311 = vmatprep.mubr.msk.bf16.mxu0 %vm47_vm0, %v31_v4  ;;  %v35_v14 = vpack.c.bf16 %v24_v11, %v23_v10  ;;  %v36_v15 = vpack.c.bf16 %v26_v13, %v25_v12  ;;  %v27_v16 = vld [vmem:[%s529_s0 + $0x60] sm:$0xff]  ;;  %v21_v19 = vld [vmem:[%s529_s0 + $0x30] sm:$0xff]  ;;  %v22_v20 = vld [vmem:[%s529_s0 + $0x38] sm:$0xff] }
   0x6   :  { %312 = vmatmul.mubr.msk.bf16.vlgmr.msra.gmra.mrb[0].mxu0 %vm47_vm0, %v32_v8  ;;  %v37_v18 = vpack.c.bf16 %v28_v17, %v27_v16  ;;  %v29_v21 = vld [vmem:[%s529_s0 + $0x70] sm:$0xff]  ;;  %v30_v22 = vld [vmem:[%s529_s0 + $0x78] sm:$0xff]  ;;  %v34_v23 = vpack.c.bf16 %v22_v20, %v21_v19 }
   0x7   :  { %315 = vmatprep.mubr.msk.bf16.mxu0 %vm47_vm0, %v33_v9  ;;  %319 = vmatprep.mubr.msk.bf16.mxu1 %vm47_vm0, %v35_v14  ;;  %v38_v24 = vpack.c.bf16 %v30_v22, %v29_v21 }
   0x8   :  { %320 = vmatmul.mubr.msk.bf16.vlgmr.msra.gmra.mrb[0].mxu1 %vm47_vm0, %v36_v15 }
   0x9   :  { %323 = vmatprep.mubr.msk.bf16.mxu1 %vm47_vm0, %v37_v18 }
   0xe   :  { %316 = vmatmul.mubr.msk.bf16.gmra.mrb[4].mxu0 %vm47_vm0, %v34_v23 }
  0x10   :  { %324 = vmatmul.mubr.msk.bf16.gmra.mrb[4].mxu1 %vm47_vm0, %v38_v24 }
  0xd9   :  { %v313_v25 = vpop.f32.mrb[0].mxu0 }
  0xda   :  { %172 = vst.msk [vmem:[%s530_s2 + $0x10] sm:$0xff] %vm169_vm1, %v313_v25  ;;  %v106_v26 = vpop.f32.mrb[1].mxu0  ;;  %v227_v32 = vmul.f32 %v313_v25, %v313_v25  ;;  %v189_v39 = vsel %vm169_vm1, %v313_v25, 0.0 }
  0xdb   :  { %170 = vst.msk [vmem:[%s530_s2] sm:$0xff] %vm169_vm1, %v106_v26  ;;  %v225_v27 = vmul.f32 %v106_v26, %v106_v26  ;;  %v314_v28 = vpop.f32.mrb[2].mxu0  ;;  %v422_v29 = vpop.f32.mrb[0].mxu1  ;;  %v186_v33 = vsel %vm169_vm1, %v106_v26, 0.0 }
  0xdc   :  { %173 = vst.msk [vmem:[%s530_s2 + $0x18] sm:$0xff] %vm169_vm1, %v314_v28  ;;  %v109_v30 = vpop.f32.mrb[3].mxu0  ;;  %180 = vst.msk [vmem:[%s530_s2 + $0x50] sm:$0xff] %vm169_vm1, %v422_v29  ;;  %v138_v31 = vpop.f32.mrb[1].mxu1  ;;  %v228_v41 = vmul.f32 %v314_v28, %v314_v28  ;;  %v244_v45 = vsel %vm169_vm1, %v227_v32, 0.0  ;;  %v191_v46 = vsel %vm169_vm1, %v314_v28, 0.0  ;;  %v235_v20 = vmul.f32 %v422_v29, %v422_v29 }
  0xdd   :  { %171 = vst.msk [vmem:[%s530_s2 + $0x8] sm:$0xff] %vm169_vm1, %v109_v30  ;;  %v187_v34 = vsel %vm169_vm1, %v109_v30, 0.0  ;;  %v226_v35 = vmul.f32 %v109_v30, %v109_v30  ;;  %178 = vst.msk [vmem:[%s530_s2 + $0x40] sm:$0xff] %vm169_vm1, %v138_v31  ;;  %v443_v36 = vpop.f32.mrb[2].mxu1  ;;  %v241_v40 = vsel %vm169_vm1, %v225_v27, 0.0  ;;  %v233_v7 = vmul.f32 %v138_v31, %v138_v31 }
  0xde   :  { %v188_v37 = vadd.f32 %v187_v34, %v186_v33  ;;  %181 = vst.msk [vmem:[%s530_s2 + $0x58] sm:$0xff] %vm169_vm1, %v443_v36  ;;  %v141_v38 = vpop.f32.mrb[3].mxu1  ;;  %v246_v51 = vsel %vm169_vm1, %v228_v41, 0.0  ;;  %v201_v12 = vsel %vm169_vm1, %v138_v31, 0.0  ;;  %v205_v24 = vsel %vm169_vm1, %v422_v29, 0.0 }
  0xdf   :  { %v242_v42 = vsel %vm169_vm1, %v226_v35, 0.0  ;;  %179 = vst.msk [vmem:[%s530_s2 + $0x48] sm:$0xff] %vm169_vm1, %v141_v38  ;;  %v256_v16 = vsel %vm169_vm1, %v233_v7, 0.0  ;;  %v234_v17 = vmul.f32 %v141_v38, %v141_v38  ;;  %v203_v21 = vsel %vm169_vm1, %v141_v38, 0.0 }
  0xe0   :  { %v190_v43 = vadd.f32 %v189_v39, %v188_v37  ;;  %v243_v44 = vadd.f32 %v242_v42, %v241_v40  ;;  %v236_v25 = vmul.f32 %v443_v36, %v443_v36  ;;  %v260_v31 = vsel %vm169_vm1, %v235_v20, 0.0 }
  0xe1   :  { %v317_v47 = vpop.f32.mrb[4].mxu0  ;;  %v258_v26 = vsel %vm169_vm1, %v234_v17, 0.0  ;;  %v207_v32 = vsel %vm169_vm1, %v443_v36, 0.0 }
  0xe2   :  { %v245_v48 = vadd.f32 %v244_v45, %v243_v44  ;;  %176 = vst.msk [vmem:[%s530_s2 + $0x30] sm:$0xff] %vm169_vm1, %v317_v47  ;;  %v122_v49 = vpop.f32.mrb[5].mxu0  ;;  %v192_v50 = vadd.f32 %v191_v46, %v190_v43  ;;  %v231_v60 = vmul.f32 %v317_v47, %v317_v47  ;;  %v197_v4 = vsel %vm169_vm1, %v317_v47, 0.0 }
  0xe3   :  { %174 = vst.msk [vmem:[%s530_s2 + $0x20] sm:$0xff] %vm169_vm1, %v122_v49  ;;  %v193_v52 = vsel %vm169_vm1, %v122_v49, 0.0  ;;  %v229_v53 = vmul.f32 %v122_v49, %v122_v49  ;;  %v318_v54 = vpop.f32.mrb[6].mxu0  ;;  %v325_v55 = vpop.f32.mrb[4].mxu1  ;;  %v262_v37 = vsel %vm169_vm1, %v236_v25, 0.0 }
  0xe4   :  { %v194_v56 = vadd.f32 %v193_v52, %v192_v50  ;;  %v247_v57 = vadd.f32 %v246_v51, %v245_v48  ;;  %177 = vst.msk [vmem:[%s530_s2 + $0x38] sm:$0xff] %vm169_vm1, %v318_v54  ;;  %v125_v58 = vpop.f32.mrb[7].mxu0  ;;  %184 = vst.msk [vmem:[%s530_s2 + $0x70] sm:$0xff] %vm169_vm1, %v325_v55  ;;  %v154_v59 = vpop.f32.mrb[5].mxu1  ;;  %v232_v5 = vmul.f32 %v318_v54, %v318_v54  ;;  %v252_v10 = vsel %vm169_vm1, %v231_v60, 0.0 }
  0xe5   :  { %v248_v61 = vsel %vm169_vm1, %v229_v53, 0.0  ;;  %175 = vst.msk [vmem:[%s530_s2 + $0x28] sm:$0xff] %vm169_vm1, %v125_v58  ;;  %v195_v62 = vsel %vm169_vm1, %v125_v58, 0.0  ;;  %v230_v63 = vmul.f32 %v125_v58, %v125_v58  ;;  %182 = vst.msk [vmem:[%s530_s2 + $0x60] sm:$0xff] %vm169_vm1, %v154_v59  ;;  %v326_v0 = vpop.f32.mrb[6].mxu1  ;;  %v199_v11 = vsel %vm169_vm1, %v318_v54, 0.0 }
  0xe6   :  { %v249_v1 = vadd.f32 %v248_v61, %v247_v57  ;;  %v196_v2 = vadd.f32 %v195_v62, %v194_v56  ;;  %185 = vst.msk [vmem:[%s530_s2 + $0x78] sm:$0xff] %vm169_vm1, %v326_v0  ;;  %v157_v3 = vpop.f32.mrb[7].mxu1  ;;  %v254_v15 = vsel %vm169_vm1, %v232_v5, 0.0  ;;  %v237_v27 = vmul.f32 %v154_v59, %v154_v59 }
  0xe7   :  { %v250_v6 = vsel %vm169_vm1, %v230_v63, 0.0  ;;  %183 = vst.msk [vmem:[%s530_s2 + $0x68] sm:$0xff] %vm169_vm1, %v157_v3  ;;  %v209_v33 = vsel %vm169_vm1, %v154_v59, 0.0  ;;  %v238_v38 = vmul.f32 %v157_v3, %v157_v3  ;;  %v239_v41 = vmul.f32 %v325_v55, %v325_v55 }
  0xe8   :  { %v198_v8 = vadd.f32 %v197_v4, %v196_v2  ;;  %v251_v9 = vadd.f32 %v250_v6, %v249_v1  ;;  %v264_v29 = vsel %vm169_vm1, %v237_v27, 0.0  ;;  %v211_v42 = vsel %vm169_vm1, %v157_v3, 0.0 }
  0xe9   :  { %v213_v45 = vsel %vm169_vm1, %v325_v55, 0.0  ;;  %v240_v46 = vmul.f32 %v326_v0, %v326_v0  ;;  %v266_v36 = vsel %vm169_vm1, %v238_v38, 0.0  ;;  %v268_v49 = vsel %vm169_vm1, %v239_v41, 0.0 }
  0xea   :  { %v253_v13 = vadd.f32 %v252_v10, %v251_v9  ;;  %v200_v14 = vadd.f32 %v199_v11, %v198_v8  ;;  %v215_v50 = vsel %vm169_vm1, %v326_v0, 0.0 }
  0xeb   :  { %v270_v53 = vsel %vm169_vm1, %v240_v46, 0.0 }
  0xec   :  { %v202_v18 = vadd.f32 %v201_v12, %v200_v14  ;;  %v255_v19 = vadd.f32 %v254_v15, %v253_v13 }
  0xee   :  { %v257_v22 = vadd.f32 %v256_v16, %v255_v19  ;;  %v204_v23 = vadd.f32 %v203_v21, %v202_v18 }
  0xf0   :  { %v206_v28 = vadd.f32 %v205_v24, %v204_v23  ;;  %v259_v30 = vadd.f32 %v258_v26, %v257_v22 }
  0xf2   :  { %v261_v34 = vadd.f32 %v260_v31, %v259_v30  ;;  %v208_v35 = vadd.f32 %v207_v32, %v206_v28 }
  0xf4   :  { %v210_v39 = vadd.f32 %v209_v33, %v208_v35  ;;  %v263_v40 = vadd.f32 %v262_v37, %v261_v34 }
  0xf6   :  { %v265_v43 = vadd.f32 %v264_v29, %v263_v40  ;;  %v212_v44 = vadd.f32 %v211_v42, %v210_v39 }
  0xf8   :  { %v214_v47 = vadd.f32 %v213_v45, %v212_v44  ;;  %v267_v48 = vadd.f32 %v266_v36, %v265_v43 }
  0xfa   :  { %v216_v51 = vadd.f32 %v215_v50, %v214_v47  ;;  %v269_v52 = vadd.f32 %v268_v49, %v267_v48 }
  0xfc   :  { %v217_v54 = vrot.slane %v216_v51, 4  ;;  %v271_v56 = vadd.f32 %v270_v53, %v269_v52 }
  0xfe   :  { %v218_v57 = vadd.f32 %v217_v54, %v216_v51  ;;  %v272_v58 = vrot.slane %v271_v56, 4 }
 0x100   :  { %v219_v59 = vrot.slane %v218_v57, 2  ;;  %v273_v60 = vadd.f32 %v272_v58, %v271_v56 }
 0x102   :  { %v220_v55 = vadd.f32 %v219_v59, %v218_v57  ;;  %v274_v61 = vrot.slane %v273_v60, 2 }
 0x104   :  { %v221_v62 = vrot.slane %v220_v55, 1  ;;  %v275_v63 = vadd.f32 %v274_v61, %v273_v60 }
 0x106   :  { %v222_v1 = vadd.f32 %v221_v62, %v220_v55  ;;  %v276_v2 = vrot.slane %v275_v63, 1 }
 0x108   :  { %224 = vst.msk [vmem:[%s531_s3] sm:$0x1] %vm223_vm2, %v222_v1  ;;  %v277_v0 = vadd.f32 %v276_v2, %v275_v63 }
 0x10a   :  { %278 = vst.msk [vmem:[%s532_s4] sm:$0x1] %vm223_vm2, %v277_v0 }

// kernel: down_forward.7
= control target key start
LH: loop header
LB: loop body
LE: loop exit
PB: predicated region body
PF: predicated region fallthrough
CT: control target
= control target key end

     0   :  { %s104_s0 = inlined_call_operand.vmem [shape: f32[32,128], index: 0, kind: input, shape index: {}]   ;;  %s105_s1 = inlined_call_operand.vmem [shape: f32[1,128], index: 1, kind: input, shape index: {}]   ;;  %s106_s2 = inlined_call_operand.vmem [shape: f32[1,128], index: 2, kind: input, shape index: {}]   ;;  %s107_s3 = inlined_call_operand.vmem [shape: f32[32,128], index: 3, kind: output, shape index: {}]  }
   0x1   :  { %v14_v0 = vld [vmem:[%s104_s0] sm:$0xff]  ;;  %v15_v4 = vld [vmem:[%s104_s0 + $0x8] sm:$0xff]  ;;  %v16_v5 = vld [vmem:[%s104_s0 + $0x10] sm:$0xff] }
   0x2   :  { %v52_v1 = vld [vmem:[%s105_s1] ss:$0 sm:$0xff]  ;;  %v17_v6 = vld [vmem:[%s104_s0 + $0x18] sm:$0xff] }
   0x3   :  { %v53_v2 = vld [vmem:[%s106_s2] ss:$0 sm:$0xff]  ;;  %v25_v3 = vmul.f32 %v52_v1, %v14_v0  ;;  %v26_v7 = vmul.f32 %v52_v1, %v15_v4  ;;  %v27_v8 = vmul.f32 %v52_v1, %v16_v5  ;;  %v28_v9 = vmul.f32 %v52_v1, %v17_v6 }
   0x5   :  { %v36_v10 = vadd.f32 %v53_v2, %v25_v3  ;;  %v37_v11 = vadd.f32 %v53_v2, %v26_v7  ;;  %v38_v12 = vadd.f32 %v53_v2, %v27_v8  ;;  %v39_v13 = vadd.f32 %v53_v2, %v28_v9 }
   0x7   :  { %v40_v14 = vmax.f32 %v36_v10, 0.0  ;;  %v41_v15 = vmax.f32 %v37_v11, 0.0  ;;  %v42_v16 = vmax.f32 %v38_v12, 0.0  ;;  %v43_v17 = vmax.f32 %v39_v13, 0.0 }
   0x9   :  { %44 = vst [vmem:[%s107_s3] sm:$0xff] %v40_v14  ;;  %45 = vst [vmem:[%s107_s3 + $0x8] sm:$0xff] %v41_v15 }
   0xa   :  { %46 = vst [vmem:[%s107_s3 + $0x10] sm:$0xff] %v42_v16  ;;  %47 = vst [vmem:[%s107_s3 + $0x18] sm:$0xff] %v43_v17 }

// kernel: down_forward.6
= control target key start
LH: loop header
LB: loop body
LE: loop exit
PB: predicated region body
PF: predicated region fallthrough
CT: control target
= control target key end

     0   :  { %s1791_s21 = smov 0   ;;  %s1988_s0 = inlined_call_operand.vmem [shape: f32[2,8,8,16], index: 0, kind: input, shape index: {}]   ;;  %s1989_s1 = inlined_call_operand.vmem [shape: f32[1,16], index: 1, kind: input, shape index: {}]   ;;  %s1990_s2 = inlined_call_operand.vmem [shape: f32[1,16], index: 2, kind: input, shape index: {}]   ;;  %s1991_s3 = inlined_call_operand.vmem [shape: bf16[9,16,32], index: 3, kind: input, shape index: {}]   ;;  %s1992_s4 = inlined_call_operand.vmem [shape: f32[2,8,8,32], index: 4, kind: output, shape index: {0}]   ;;  %s1993_s5 = inlined_call_operand.vmem [shape: f32[2,1,32], index: 5, kind: output, shape index: {1}]   ;;  %s1994_s6 = inlined_call_operand.vmem [shape: f32[2,1,32], index: 6, kind: output, shape index: {2}]  }
   0x1 LB: > { %s1452_s22 = sadd.s32 4294967295, %s1753_s21   ;;  %p1456_p0 = scmp.ge.s32.totalorder %s1753_s21, 1  ;;  %s1753_s21 = sphi %s1791_s21, %s17_s21  }
   0x2   : > { %p217_p1 = scmp.lt.s32.totalorder %s1753_s21, 3 }
   0x4   : > { %p218_p2 = pnand %p1456_p0, %p217_p1 }
   0x5   : > { %v1738_v0 = vld [vmem:[%s1991_s3 + $0x8] sm:$0xff] (!%p218_p2)   ;;  %p253_p3 = scmp.lt.s32.totalorder (!%p218_p2), %s1452_s22, 1  ;;  %v1805_v1 = vld [vmem:[%s1991_s3 + $0x20] sm:$0xff] (!%p218_p2)   ;;  %vm316_vm0 = vcmask (!%p218_p2), 130048   ;;  %v1755_v3 = vmov (!%p218_p2), 0.0   ;;  %vm318_vm1 = vcmask (!%p218_p2), 123904  }
   0x6   : > { %221 = sbr.rel (%p218_p2) target bundleno = 341 (0x155), region = 36  ;;  %1573 = vmatprep.subr.bf16.mxu1 (!%p218_p2), %v1738_v0  ;;  %v1461_v2 = vld [vmem:[%s1989_s1] ss:$0 sm:$0xff] (!%p218_p2)  ;;  %1613 = vmatprep.subr.bf16.mxu0 (!%p218_p2), %v1805_v1  ;;  %317 = vst.msk [vmem:[#allocation2] sm:$0xff] (!%p218_p2), %vm316_vm0, %v1755_v3  ;;  %320 = vst.msk [vmem:[#allocation2 + $0x10] sm:$0xff] (!%p218_p2), %vm316_vm0, %v1755_v3  ;;  %v1843_v5 = vld [vmem:[%s1991_s3 + $0x28] sm:$0xff] (!%p218_p2)  }
   0x7   : > { %1574 = vmatpush3.bf16.msra.mxu1 (!%p218_p2), %v1738_v0  ;;  %322 = vst.msk [vmem:[#allocation2 + $0x20] sm:$0xff] (!%p218_p2), %vm316_vm0, %v1755_v3  ;;  %324 = vst.msk [vmem:[#allocation2 + $0x30] sm:$0xff] (!%p218_p2), %vm316_vm0, %v1755_v3  ;;  %v1826_v4 = vld [vmem:[%s1991_s3] sm:$0xff] (!%p218_p2)   ;;  %1614 = vmatpush3.bf16.msra.mxu0 (!%p218_p2), %v1805_v1  ;;  %v1742_v53 = vld [vmem:[%s1991_s3 + $0x30] sm:$0xff] (!%p218_p2)   ;;  %vm1285_vm2 = vcmask (!%p218_p2), 261120   ;;  %vm1315_vm3 = vcmask (!%p218_p2), 253952  }
   0x8   : > { %326 = vst.msk [vmem:[#allocation2 + $0x40] sm:$0xff] (!%p218_p2), %vm316_vm0, %v1755_v3  ;;  %328 = vst.msk [vmem:[#allocation2 + $0x50] sm:$0xff] (!%p218_p2), %vm316_vm0, %v1755_v3  ;;  %v1462_v6 = vld [vmem:[%s1990_s2] ss:$0 sm:$0xff] (!%p218_p2)  ;;  %1583 = vmatprep.subr.bf16.mxu1 (!%p218_p2), %v1826_v4  ;;  %1623 = vmatprep.subr.bf16.mxu0 (!%p218_p2), %v1843_v5  ;;  %v1743_v54 = vld [vmem:[%s1991_s3 + $0x10] sm:$0xff] (!%p218_p2)  }
   0x9   : > { %330 = vst.msk [vmem:[#allocation2 + $0x60] sm:$0xff] (!%p218_p2), %vm316_vm0, %v1755_v3  ;;  %332 = vst.msk [vmem:[#allocation2 + $0x70] sm:$0xff] (!%p218_p2), %vm316_vm0, %v1755_v3 }
   0xa   : > { %334 = vst.msk [vmem:[#allocation2 + $0x80] sm:$0xff] (!%p218_p2), %vm316_vm0, %v1755_v3  ;;  %336 = vst.msk [vmem:[#allocation2 + $0x90] sm:$0xff] (!%p218_p2), %vm316_vm0, %v1755_v3 }
   0xb   : > { %319 = vst.msk [vmem:[#allocation2 + $0x8] sm:$0x3] (!%p218_p2), %vm318_vm1, %v1755_v3  ;;  %321 = vst.msk [vmem:[#allocation2 + $0x18] sm:$0x3] (!%p218_p2), %vm318_vm1, %v1755_v3 }
   0xc   : > { %323 = vst.msk [vmem:[#allocation2 + $0x28] sm:$0x3] (!%p218_p2), %vm318_vm1, %v1755_v3  ;;  %325 = vst.msk [vmem:[#allocation2 + $0x38] sm:$0x3] (!%p218_p2), %vm318_vm1, %v1755_v3 }
   0xd   : > { %s1996_s22 = smov (!%p253_p3, %s1452_s22), 1  ;;  %327 = vst.msk [vmem:[#allocation2 + $0x48] sm:$0x3] %vm318_vm1, %v1755_v3  ;;  %329 = vst.msk [vmem:[#allocation2 + $0x58] sm:$0x3] %vm318_vm1, %v1755_v3  ;;  %v347_v57 = vld [vmem:[#allocation2] sm:$0xff] }
   0xe   : > { %s1526_s7 = sshll.u32 %s1996_s22, 6  ;;  %331 = vst.msk [vmem:[#allocation2 + $0x68] sm:$0x3] %vm318_vm1, %v1755_v3  ;;  %333 = vst.msk [vmem:[#allocation2 + $0x78] sm:$0x3] %vm318_vm1, %v1755_v3  ;;  %s265_s8 = scalar_lea.vmem %s1993_s5, %s1996_s22 }
   0xf   : > { %335 = vst.msk [vmem:[#allocation2 + $0x88] sm:$0x3] %vm318_vm1, %v1755_v3  ;;  %337 = vst.msk [vmem:[#allocation2 + $0x98] sm:$0x3] %vm318_vm1, %v1755_v3  ;;  %s257_s12 = scalar_lea.vmem %s1988_s0, %s1526_s7  ;;  %s1943_s29 = scalar_lea.vmem %s1992_s4, %s1526_s7 }
  0x10   : > { %v270_v7 = vld [vmem:[%s257_s12] sm:$0xff]  ;;  %v271_v8 = vld [vmem:[%s257_s12 + $0x8] sm:$0xff]  ;;  %v272_v9 = vld [vmem:[%s257_s12 + $0x10] sm:$0xff]  ;;  %s268_s11 = scalar_lea.vmem %s1994_s6, %s1996_s22 }
  0x11   : > { %v285_v10 = vmul.f32 %v1461_v2, %v270_v7  ;;  %v286_v11 = vmul.f32 %v1461_v2, %v271_v8  ;;  %v287_v12 = vmul.f32 %v1461_v2, %v272_v9  ;;  %v273_v13 = vld [vmem:[%s257_s12 + $0x18] sm:$0xff]  ;;  %v274_v14 = vld [vmem:[%s257_s12 + $0x20] sm:$0xff]  ;;  %v275_v15 = vld [vmem:[%s257_s12 + $0x28] sm:$0xff] }
  0x12   : > { %v288_v16 = vmul.f32 %v1461_v2, %v273_v13  ;;  %v289_v17 = vmul.f32 %v1461_v2, %v274_v14  ;;  %v276_v18 = vld [vmem:[%s257_s12 + $0x30] sm:$0xff]  ;;  %v290_v19 = vmul.f32 %v1461_v2, %v275_v15  ;;  %v277_v24 = vld [vmem:[%s257_s12 + $0x38] sm:$0xff]  ;;  %v361_v39 = vld [vmem:[#allocation2 + $0x1] sm:$0xff] }
  0x13   : > { %v300_v20 = vadd.f32 %v1462_v6, %v285_v10  ;;  %v301_v21 = vadd.f32 %v1462_v6, %v286_v11  ;;  %v302_v22 = vadd.f32 %v1462_v6, %v287_v12  ;;  %v291_v23 = vmul.f32 %v1461_v2, %v276_v18  ;;  %v1744_v8 = vld [vmem:[%s1991_s3 + $0x38] sm:$0xff]  }
  0x14   : > { %v303_v25 = vadd.f32 %v1462_v6, %v288_v16  ;;  %v304_v26 = vadd.f32 %v1462_v6, %v289_v17  ;;  %v305_v27 = vadd.f32 %v1462_v6, %v290_v19  ;;  %v292_v28 = vmul.f32 %v1461_v2, %v277_v24  ;;  %v1745_v13 = vld [vmem:[%s1991_s3 + $0x18] sm:$0xff]   ;;  %v542_v17 = vld [vmem:[#allocation2 + $0x2] sm:$0xff] }
  0x15   : > { %v308_v29 = vmax.f32 %v300_v20, 0.0  ;;  %v309_v30 = vmax.f32 %v301_v21, 0.0  ;;  %v310_v31 = vmax.f32 %v302_v22, 0.0  ;;  %v306_v32 = vadd.f32 %v1462_v6, %v291_v23  ;;  %v1746_v20 = vld [vmem:[%s1991_s3 + $0x40] sm:$0xff]   ;;  %v974_v23 = vld [vmem:[#allocation2 + $0x90] sm:$0xff] }
  0x16   : > { %v311_v33 = vmax.f32 %v303_v25, 0.0  ;;  %v312_v34 = vmax.f32 %v304_v26, 0.0  ;;  %v313_v35 = vmax.f32 %v305_v27, 0.0  ;;  %v307_v36 = vadd.f32 %v1462_v6, %v292_v28 }
  0x17   : > { %339 = vst.msk [vmem:[#allocation2 + $0x11] sm:$0xff] %vm316_vm0, %v308_v29  ;;  %340 = vst.msk [vmem:[#allocation2 + $0x21] sm:$0xff] %vm316_vm0, %v309_v30  ;;  %v314_v37 = vmax.f32 %v306_v32, 0.0  ;;  %v1080_v30 = vld [vmem:[#allocation2 + $0x91] sm:$0xff] }
  0x18   : > { %341 = vst.msk [vmem:[#allocation2 + $0x31] sm:$0xff] %vm316_vm0, %v310_v31  ;;  %342 = vst.msk [vmem:[#allocation2 + $0x41] sm:$0xff] %vm316_vm0, %v311_v33  ;;  %v315_v38 = vmax.f32 %v307_v36, 0.0 }
  0x19   : > { %343 = vst.msk [vmem:[#allocation2 + $0x51] sm:$0xff] %vm316_vm0, %v312_v34  ;;  %344 = vst.msk [vmem:[#allocation2 + $0x61] sm:$0xff] %vm316_vm0, %v313_v35 }
  0x1a   : > { %345 = vst.msk [vmem:[#allocation2 + $0x71] sm:$0xff] %vm316_vm0, %v314_v37  ;;  %346 = vst.msk [vmem:[#allocation2 + $0x81] sm:$0xff] %vm316_vm0, %v315_v38 }
  0x1e   : > { %v362_v40 = vld [vmem:[#allocation2 + $0x11] sm:$0xff]  ;;  %v755_v41 = vld [vmem:[#allocation2 + $0x21] sm:$0xff] }
  0x1f   : > { %v364_v42 = vld [vmem:[#allocation2 + $0x31] sm:$0xff]  ;;  %v369_v43 = vpack.c.bf16 %v362_v40, %v361_v39  ;;  %v762_v44 = vpack.c.bf16 %v755_v41, %v362_v40  ;;  %v757_v46 = vld [vmem:[#allocation2 + $0x41] sm:$0xff] }
  0x20   : > { %v1863_v45 = vpack.c.bf16 %v364_v42, %v755_v41  ;;  %v1865_v47 = vld [vmem:[#allocation2 + $0x51] sm:$0xff]  ;;  %v763_v48 = vpack.c.bf16 %v757_v46, %v364_v42  ;;  %v861_v51 = vld [vmem:[#allocation2 + $0x22] sm:$0xff] }
  0x21   : > { %v1868_v49 = vpack.c.bf16 %v1865_v47, %v757_v46  ;;  %v860_v50 = vld [vmem:[#allocation2 + $0x12] sm:$0xff]  ;;  %1575 = vmatprep.mubr.msk.bf16.mxu1 %vm316_vm0, %v369_v43  ;;  %1615 = vmatprep.mubr.msk.bf16.mxu0 %vm316_vm0, %v762_v44  ;;  %v1883_v55 = vld [vmem:[#allocation2 + $0x61] sm:$0xff] }
  0x22   : > { %v868_v52 = vpack.c.bf16 %v861_v51, %v860_v50  ;;  %1576 = vmatmul.mubr.msk.bf16.vlgmr.msra.gmra.mrb[0].mxu1 %vm316_vm0, %v1863_v45  ;;  %1616 = vmatmul.mubr.msk.bf16.vlgmr.msra.gmra.mrb[0].mxu0 %vm316_vm0, %v763_v48  ;;  %v1885_v56 = vld [vmem:[#allocation2 + $0x71] sm:$0xff]  ;;  %v863_v61 = vld [vmem:[#allocation2 + $0x42] sm:$0xff]  ;;  %v550_v19 = vpack.c.bf16 %v860_v50, %v542_v17  ;;  %v764_v34 = vpack.c.bf16 %v1883_v55, %v1865_v47 }
  0x23   : > { %1584 = vmatpush3.bf16.msra.mxu1 %v1826_v4  ;;  %1624 = vmatpush3.bf16.msra.mxu0 %v1843_v5  ;;  %v348_v58 = vld [vmem:[#allocation2 + $0x10] sm:$0xff]  ;;  %v372_v59 = vpack.c.bf16 %v1885_v56, %v1883_v55  ;;  %v865_v0 = vld [vmem:[#allocation2 + $0x62] sm:$0xff] }
  0x24   : > { %1579 = vmatprep.mubr.msk.bf16.mxu1 %vm316_vm0, %v1868_v49  ;;  %1625 = vmatprep.mubr.msk.bf16.mxu0 %vm316_vm0, %v868_v52  ;;  %v862_v60 = vld [vmem:[#allocation2 + $0x32] sm:$0xff]  ;;  %v355_v62 = vpack.c.bf16 %v348_v58, %v347_v57  ;;  %v349_v3 = vld [vmem:[#allocation2 + $0x20] sm:$0xff] }
  0x25   : > { %1633 = vmatprep.subr.bf16.mxu0 %v1742_v53  ;;  %1593 = vmatprep.subr.bf16.mxu1 %v1743_v54  ;;  %v864_v63 = vld [vmem:[#allocation2 + $0x52] sm:$0xff]  ;;  %v869_v2 = vpack.c.bf16 %v863_v61, %v862_v60  ;;  %v351_v6 = vld [vmem:[#allocation2 + $0x40] sm:$0xff]  ;;  %v551_v21 = vpack.c.bf16 %v862_v60, %v861_v51  ;;  %v656_v27 = vpack.c.bf16 %v349_v3, %v348_v58 }
  0x26   : > { %v350_v4 = vld [vmem:[#allocation2 + $0x30] sm:$0xff]  ;;  %v870_v5 = vpack.c.bf16 %v865_v0, %v864_v63  ;;  %v867_v11 = vld [vmem:[#allocation2 + $0x82] sm:$0xff]  ;;  %v552_v24 = vpack.c.bf16 %v864_v63, %v863_v61 }
  0x27   : > { %v352_v7 = vld [vmem:[#allocation2 + $0x50] sm:$0xff]  ;;  %v356_v9 = vpack.c.bf16 %v350_v4, %v349_v3  ;;  %v353_v15 = vld [vmem:[#allocation2 + $0x60] sm:$0xff]  ;;  %v657_v28 = vpack.c.bf16 %v351_v6, %v350_v4 }
  0x28   : > { %v866_v10 = vld [vmem:[#allocation2 + $0x72] sm:$0xff]  ;;  %v357_v12 = vpack.c.bf16 %v352_v7, %v351_v6  ;;  %v973_v22 = vld [vmem:[#allocation2 + $0x80] sm:$0xff]  ;;  %v658_v31 = vpack.c.bf16 %v353_v15, %v352_v7 }
  0x29   : > { %v871_v14 = vpack.c.bf16 %v867_v11, %v866_v10  ;;  %v354_v16 = vld [vmem:[#allocation2 + $0x70] sm:$0xff]  ;;  %v978_v25 = vpack.c.bf16 %v974_v23, %v973_v22  ;;  %v553_v26 = vpack.c.bf16 %v866_v10, %v865_v0  ;;  %v1079_v29 = vld [vmem:[#allocation2 + $0x81] sm:$0xff] }
  0x2a   : > { %1580 = vmatmul.mubr.msk.bf16.gmra.mrb[4].mxu1 %vm316_vm0, %v372_v59  ;;  %v358_v18 = vpack.c.bf16 %v354_v16, %v353_v15  ;;  %v1084_v32 = vpack.c.bf16 %v1080_v30, %v1079_v29  ;;  %v659_v33 = vpack.c.bf16 %v973_v22, %v354_v16  ;;  %v765_v35 = vpack.c.bf16 %v1079_v29, %v1885_v56 }
  0x2b   : > { %1585 = vmatprep.mubr.msk.bf16.mxu1 %vm316_vm0, %v355_v62 }
  0x2e   : > { %1626 = vmatmul.mubr.msk.bf16.vlgmr.msra.gmra.mrb[0].mxu0 %vm316_vm0, %v869_v2 }
  0x2f   : > { %1634 = vmatpush3.bf16.msra.mxu0 %v1742_v53  ;;  %1629 = vmatprep.mubr.msk.bf16.mxu0 %vm316_vm0, %v870_v5 }
  0x30   : > { %1643 = vmatprep.subr.bf16.mxu0 %v1744_v8 }
  0x32   : > { %1586 = vmatmul.mubr.msk.bf16.vlgmr.msra.gmra.mrb[0].mxu1 %vm316_vm0, %v356_v9 }
  0x33   : > { %1594 = vmatpush3.bf16.msra.mxu1 %v1743_v54  ;;  %1589 = vmatprep.mubr.msk.bf16.mxu1 %vm316_vm0, %v357_v12 }
  0x34   : > { %1603 = vmatprep.subr.bf16.mxu1 %v1745_v13 }
  0x36   : > { %1630 = vmatmul.mubr.msk.bf16.gmra.mrb[4].mxu0 %vm316_vm0, %v871_v14 }
  0x37   : > { %1635 = vmatprep.mubr.msk.bf16.mxu0 %vm316_vm0, %v356_v9 }
  0x3a   : > { %1590 = vmatmul.mubr.msk.bf16.gmra.mrb[4].mxu1 %vm316_vm0, %v358_v18 }
  0x3b   : > { %1595 = vmatprep.mubr.msk.bf16.mxu1 %vm316_vm0, %v550_v19 }
  0x3e   : > { %1636 = vmatmul.mubr.msk.bf16.vlgmr.msra.gmra.mrb[0].mxu0 %vm316_vm0, %v357_v12 }
  0x3f   : > { %1644 = vmatpush3.bf16.msra.mxu0 %v1744_v8  ;;  %1639 = vmatprep.mubr.msk.bf16.mxu0 %vm316_vm0, %v358_v18 }
  0x40   : > { %1653 = vmatprep.subr.bf16.mxu0 %v1746_v20 }
  0x42   : > { %1596 = vmatmul.mubr.msk.bf16.vlgmr.msra.gmra.mrb[0].mxu1 %vm316_vm0, %v551_v21 }
  0x43   : > { %1604 = vmatpush3.bf16.msra.mxu1 %v1745_v13  ;;  %1599 = vmatprep.mubr.msk.bf16.mxu1 %vm316_vm0, %v552_v24 }
  0x44   : > { %1663 = vmatprep.subr.bf16.mxu1 %v1805_v1 }
  0x46   : > { %1640 = vmatmul.mubr.msk.bf16.gmra.mrb[4].mxu0 %vm316_vm0, %v978_v25 }
  0x47   : > { %1645 = vmatprep.mubr.msk.bf16.mxu0 %vm316_vm0, %v1863_v45 }
  0x4a   : > { %1600 = vmatmul.mubr.msk.bf16.gmra.mrb[4].mxu1 %vm316_vm0, %v553_v26 }
  0x4b   : > { %1605 = vmatprep.mubr.msk.bf16.mxu1 %vm316_vm0, %v656_v27 }
  0x4e   : > { %1646 = vmatmul.mubr.msk.bf16.vlgmr.msra.gmra.mrb[0].mxu0 %vm316_vm0, %v1868_v49 }
  0x4f   : > { %1654 = vmatpush3.bf16.msra.mxu0 %v1746_v20  ;;  %1649 = vmatprep.mubr.msk.bf16.mxu0 %vm316_vm0, %v372_v59 }
  0x52   : > { %1606 = vmatmul.mubr.msk.bf16.vlgmr.msra.gmra.mrb[0].mxu1 %vm316_vm0, %v657_v28 }
  0x53   : > { %1664 = vmatpush3.bf16.msra.mxu1 %v1805_v1  ;;  %1609 = vmatprep.mubr.msk.bf16.mxu1 %vm316_vm0, %v658_v31  ;;  %v1186_v1 = vld [vmem:[#allocation2 + $0x92] sm:$0xff] }
  0x54   : > { %v1190_v36 = vpack.c.bf16 %v1186_v1, %v867_v11 }
  0x56   : > { %1650 = vmatmul.mubr.msk.bf16.gmra.mrb[4].mxu0 %vm316_vm0, %v1084_v32 }
  0x57   : > { %1655 = vmatprep.mubr.msk.bf16.mxu0 %vm316_vm0, %v551_v21 }
  0x5a   : > { %1610 = vmatmul.mubr.msk.bf16.gmra.mrb[4].mxu1 %vm316_vm0, %v659_v33 }
  0x5b   : > { %1619 = vmatprep.mubr.msk.bf16.mxu1 %vm316_vm0, %v764_v34 }
  0x5e   : > { %1656 = vmatmul.mubr.msk.bf16.vlgmr.msra.gmra.mrb[0].mxu0 %vm316_vm0, %v552_v24 }
  0x5f   : > { %1659 = vmatprep.mubr.msk.bf16.mxu0 %vm316_vm0, %v553_v26 }
  0x66   : > { %1620 = vmatmul.mubr.msk.bf16.vlgmr.msra.gmra.mrb[4].mxu1 %vm316_vm0, %v765_v35  ;;  %1660 = vmatmul.mubr.msk.bf16.gmra.mrb[4].mxu0 %vm316_vm0, %v1190_v36 }
 0x125   : > { %v1607_v37 = vpop.f32.mrb[0].mxu1 }
 0x126   : > { %v715_v38 = vpop.f32.mrb[1].mxu1 }
 0x127   : > { %v1608_v39 = vpop.f32.mrb[2].mxu1 }
 0x128   : > { %v718_v40 = vpop.f32.mrb[3].mxu1 }
 0x131   : > { %v1657_v41 = vpop.f32.mrb[0].mxu0 }
 0x132   : > { %v1665_v42 = vadd.f32 %v1657_v41, %v1607_v37  ;;  %v1246_v43 = vpop.f32.mrb[1].mxu0 }
 0x133   : > { %v1666_v44 = vadd.f32 %v1246_v43, %v715_v38  ;;  %v1658_v45 = vpop.f32.mrb[2].mxu0 }
 0x134   : > { %1288 = vst.msk [vmem:[%s1943_s29 + $0x10] sm:$0xff] %vm1285_vm2, %v1665_v42  ;;  %v1667_v46 = vadd.f32 %v1658_v45, %v1608_v39  ;;  %v1249_v47 = vpop.f32.mrb[3].mxu0  ;;  %v1319_v50 = vmul.f32 %v1665_v42, %v1665_v42  ;;  %v1297_v56 = vsel %vm1285_vm2, %v1665_v42, 0.0 }
 0x135   : > { %1286 = vst.msk [vmem:[%s1943_s29] sm:$0xff] %vm1285_vm2, %v1666_v44  ;;  %v1317_v48 = vmul.f32 %v1666_v44, %v1666_v44  ;;  %v1668_v49 = vadd.f32 %v1249_v47, %v718_v40  ;;  %v1294_v51 = vsel %vm1285_vm2, %v1666_v44, 0.0 }
 0x136   : > { %1289 = vst.msk [vmem:[%s1943_s29 + $0x18] sm:$0xff] %vm1285_vm2, %v1667_v46  ;;  %v1320_v54 = vmul.f32 %v1667_v46, %v1667_v46  ;;  %v1328_v3 = vsel %vm1285_vm2, %v1319_v50, 0.0  ;;  %v1299_v4 = vsel %vm1285_vm2, %v1667_v46, 0.0 }
 0x137   : > { %1287 = vst.msk [vmem:[%s1943_s29 + $0x8] sm:$0xff] %vm1285_vm2, %v1668_v49  ;;  %v1295_v52 = vsel %vm1285_vm2, %v1668_v49, 0.0  ;;  %v1318_v53 = vmul.f32 %v1668_v49, %v1668_v49  ;;  %v1325_v57 = vsel %vm1285_vm2, %v1317_v48, 0.0 }
 0x138   : > { %v1296_v55 = vadd.f32 %v1295_v52, %v1294_v51  ;;  %v1330_v8 = vsel %vm1285_vm2, %v1320_v54, 0.0 }
 0x139   : > { %v1326_v58 = vsel %vm1285_vm2, %v1318_v53, 0.0  ;;  %v1621_v59 = vpop.f32.mrb[4].mxu1  ;;  %v1661_v60 = vpop.f32.mrb[4].mxu0 }
 0x13a   : > { %v1298_v61 = vadd.f32 %v1297_v56, %v1296_v55  ;;  %v1327_v62 = vadd.f32 %v1326_v58, %v1325_v57  ;;  %v1669_v63 = vadd.f32 %v1661_v60, %v1621_v59  ;;  %v837_v0 = vpop.f32.mrb[5].mxu1  ;;  %v1262_v2 = vpop.f32.mrb[5].mxu0 }
 0x13b   : > { %v1670_v5 = vadd.f32 %v1262_v2, %v837_v0  ;;  %v1622_v6 = vpop.f32.mrb[6].mxu1  ;;  %v1662_v7 = vpop.f32.mrb[6].mxu0 }
 0x13c   : > { %v1329_v9 = vadd.f32 %v1328_v3, %v1327_v62  ;;  %1292 = vst.msk [vmem:[%s1943_s29 + $0x30] sm:$0xff] %vm1285_vm2, %v1669_v63  ;;  %v1300_v10 = vadd.f32 %v1299_v4, %v1298_v61  ;;  %v840_v11 = vpop.f32.mrb[7].mxu1  ;;  %v1265_v12 = vpop.f32.mrb[7].mxu0  ;;  %v1671_v15 = vadd.f32 %v1662_v7, %v1622_v6  ;;  %v1323_v21 = vmul.f32 %v1669_v63, %v1669_v63 }
 0x13d   : > { %1290 = vst.msk [vmem:[%s1943_s29 + $0x20] sm:$0xff] %vm1285_vm2, %v1670_v5  ;;  %v1301_v13 = vsel %vm1285_vm2, %v1670_v5, 0.0  ;;  %v1321_v14 = vmul.f32 %v1670_v5, %v1670_v5  ;;  %v1672_v16 = vadd.f32 %v1265_v12, %v840_v11  ;;  %v1305_v25 = vsel %vm1285_vm2, %v1669_v63, 0.0 }
 0x13e   : > { %v1302_v17 = vadd.f32 %v1301_v13, %v1300_v10  ;;  %v1331_v18 = vadd.f32 %v1330_v8, %v1329_v9  ;;  %1293 = vst.msk [vmem:[%s1943_s29 + $0x38] sm:$0xff] %vm1285_vm2, %v1671_v15  ;;  %v1324_v26 = vmul.f32 %v1671_v15, %v1671_v15  ;;  %v1307_v29 = vsel %vm1285_vm2, %v1671_v15, 0.0 }
 0x13f   : > { %v1332_v19 = vsel %vm1285_vm2, %v1321_v14, 0.0  ;;  %1291 = vst.msk [vmem:[%s1943_s29 + $0x28] sm:$0xff] %vm1285_vm2, %v1672_v16  ;;  %v1303_v20 = vsel %vm1285_vm2, %v1672_v16, 0.0  ;;  %v1322_v24 = vmul.f32 %v1672_v16, %v1672_v16  ;;  %v1336_v31 = vsel %vm1285_vm2, %v1323_v21, 0.0 }
 0x140   : > { %v1333_v22 = vadd.f32 %v1332_v19, %v1331_v18  ;;  %v1304_v23 = vadd.f32 %v1303_v20, %v1302_v17  ;;  %v1338_v34 = vsel %vm1285_vm2, %v1324_v26, 0.0 }
 0x141   : > { %v1334_v28 = vsel %vm1285_vm2, %v1322_v24, 0.0 }
 0x142   : > { %v1306_v27 = vadd.f32 %v1305_v25, %v1304_v23  ;;  %v1335_v30 = vadd.f32 %v1334_v28, %v1333_v22 }
 0x144   : > { %v1308_v32 = vadd.f32 %v1307_v29, %v1306_v27  ;;  %v1337_v33 = vadd.f32 %v1336_v31, %v1335_v30 }
 0x146   : > { %v1309_v1 = vrot.slane %v1308_v32, 4  ;;  %v1339_v35 = vadd.f32 %v1338_v34, %v1337_v33 }
 0x148   : > { %v1310_v36 = vadd.f32 %v1309_v1, %v1308_v32  ;;  %v1340_v37 = vrot.slane %v1339_v35, 4 }
 0x14a   : > { %v1311_v38 = vrot.slane %v1310_v36, 2  ;;  %v1341_v39 = vadd.f32 %v1340_v37, %v1339_v35 }
 0x14c   : > { %v1312_v40 = vadd.f32 %v1311_v38, %v1310_v36  ;;  %v1342_v41 = vrot.slane %v1341_v39, 2 }
 0x14e   : > { %v1313_v42 = vrot.slane %v1312_v40, 1  ;;  %v1343_v43 = vadd.f32 %v1342_v41, %v1341_v39 }
 0x150   : > { %v1314_v44 = vadd.f32 %v1313_v42, %v1312_v40  ;;  %v1344_v45 = vrot.slane %v1343_v43, 1 }
 0x152   : > { %1316 = vst.msk [vmem:[%s265_s8] sm:$0x1] %vm1315_vm3, %v1314_v44  ;;  %v1345_v46 = vadd.f32 %v1344_v45, %v1343_v43 }
 0x154   : > { %1346 = vst.msk [vmem:[%s268_s11] sm:$0x1] %vm1315_vm3, %v1345_v46 }
 0x155 PF: > { %s17_s21 = sadd.s32 1, %s1753_s21  }
 0x156   : > { %p14_p4 = scmp.ge.s32.totalorder %s17_s21, 4  }
 0x158   :  { %16 = sbr.rel (!%p14_p4) target bundleno = 1 (0x1), region = 100 }

// kernel: down_forward.5
= control target key start
LH: loop header
LB: loop body
LE: loop exit
PB: predicated region body
PF: predicated region fallthrough
CT: control target
= control target key end

     0   :  { %s1732_s21 = smov 0   ;;  %s1959_s0 = inlined_call_operand.vmem [shape: f32[2,8,8,8], index: 0, kind: input, shape index: {}]   ;;  %s1960_s1 = inlined_call_operand.vmem [shape: f32[1,8], index: 1, kind: input, shape index: {}]   ;;  %s1961_s2 = inlined_call_operand.vmem [shape: f32[1,8], index: 2, kind: input, shape index: {}]   ;;  %s1962_s3 = inlined_call_operand.vmem [shape: bf16[9,8,16], index: 3, kind: input, shape index: {}]   ;;  %s1963_s4 = inlined_call_operand.vmem [shape: f32[2,8,8,16], index: 4, kind: output, shape index: {0}]   ;;  %s1964_s5 = inlined_call_operand.vmem [shape: f32[2,1,16], index: 5, kind: output, shape index: {1}]   ;;  %s1965_s6 = inlined_call_operand.vmem [shape: f32[2,1,16], index: 6, kind: output, shape index: {2}]  }
   0x1 LB: > { %s1409_s22 = sadd.s32 4294967295, %s1694_s21   ;;  %p1413_p0 = scmp.ge.s32.totalorder %s1694_s21, 1  ;;  %s1694_s21 = sphi %s1732_s21, %s17_s21  }
   0x2   : > { %p217_p1 = scmp.lt.s32.totalorder %s1694_s21, 3 }
   0x4   : > { %p218_p2 = pnand %p1413_p0, %p217_p1 }
   0x5   : > { %v1420_v0 = vld [vmem:[%s1962_s3 + $0x4] sm:$0xf] (!%p218_p2)  ;;  %vm378_vm0 = vcmask (!%p218_p2), 1043456   ;;  %v1746_v1 = vld [vmem:[%s1962_s3 + $0x10] sm:$0xf] (!%p218_p2)  ;;  %p253_p3 = scmp.lt.s32.totalorder (!%p218_p2), %s1409_s22, 1 }
   0x6   : > { %221 = sbr.rel (%p218_p2) target bundleno = 339 (0x153), region = 36  ;;  %1669 = vmatprep.subr.msk.bf16.mxu1 (!%p218_p2), %vm378_vm0, %v1420_v0  ;;  %1673 = vmatprep.subr.msk.bf16.mxu0 (!%p218_p2), %vm378_vm0, %v1746_v1  ;;  %v380_v2 = vsel (!%p218_p2), %vm378_vm0, %v1420_v0, 0  ;;  %v1754_v3 = vsel (!%p218_p2), %vm378_vm0, %v1746_v1, 0  ;;  %vm308_vm1 = vcmask (!%p218_p2), 64512   ;;  %vm310_vm2 = vcmask (!%p218_p2), 58368  }
   0x7   : > { %1514 = vmatpush3.bf16.msra.mxu1 (!%p218_p2), %v380_v2  ;;  %1554 = vmatpush3.bf16.msra.mxu0 (!%p218_p2), %v1754_v3  ;;  %v1762_v4 = vld [vmem:[%s1962_s3] sm:$0xf] (!%p218_p2)  ;;  %v1696_v5 = vmov (!%p218_p2), 0.0   ;;  %v1444_v6 = vld [vmem:[%s1962_s3 + $0x14] sm:$0xf] (!%p218_p2)  ;;  %vm1242_vm3 = vcmask (!%p218_p2), 130048  }
   0x8   : > { %309 = vst.msk [vmem:[#allocation2] sm:$0xff] (!%p218_p2), %vm308_vm1, %v1696_v5  ;;  %312 = vst.msk [vmem:[#allocation2 + $0x10] sm:$0xff] (!%p218_p2), %vm308_vm1, %v1696_v5  ;;  %1670 = vmatprep.subr.msk.bf16.mxu1 (!%p218_p2), %vm378_vm0, %v1762_v4  ;;  %v1418_v7 = vld [vmem:[%s1960_s1] ss:$0 sm:$0xff] (!%p218_p2)  ;;  %1675 = vmatprep.subr.msk.bf16.mxu0 (!%p218_p2), %vm378_vm0, %v1444_v6  ;;  %v460_v42 = vsel (!%p218_p2), %vm378_vm0, %v1762_v4, 0  ;;  %v860_v44 = vsel (!%p218_p2), %vm378_vm0, %v1444_v6, 0 }
   0x9   : > { %311 = vst.msk [vmem:[#allocation2 + $0x8] sm:$0x3] (!%p218_p2), %vm310_vm2, %v1696_v5  ;;  %313 = vst.msk [vmem:[#allocation2 + $0x18] sm:$0x3] (!%p218_p2), %vm310_vm2, %v1696_v5  ;;  %v1419_v8 = vld [vmem:[%s1961_s2] ss:$0 sm:$0xff] (!%p218_p2) }
   0xa   : > { %314 = vst.msk [vmem:[#allocation2 + $0x20] sm:$0xff] (!%p218_p2), %vm308_vm1, %v1696_v5  ;;  %316 = vst.msk [vmem:[#allocation2 + $0x30] sm:$0xff] (!%p218_p2), %vm308_vm1, %v1696_v5  ;;  %v1449_v49 = vld [vmem:[%s1962_s3 + $0x18] sm:$0xf] (!%p218_p2)  ;;  %v1429_v50 = vld [vmem:[%s1962_s3 + $0x8] sm:$0xf] (!%p218_p2) }
   0xb   : > { %315 = vst.msk [vmem:[#allocation2 + $0x28] sm:$0x3] (!%p218_p2), %vm310_vm2, %v1696_v5  ;;  %317 = vst.msk [vmem:[#allocation2 + $0x38] sm:$0x3] (!%p218_p2), %vm310_vm2, %v1696_v5  ;;  %v963_v2 = vsel (!%p218_p2), %vm378_vm0, %v1449_v49, 0  ;;  %vm1272_vm4 = vcmask (!%p218_p2), 122880  }
   0xc   : > { %318 = vst.msk [vmem:[#allocation2 + $0x40] sm:$0xff] (!%p218_p2), %vm308_vm1, %v1696_v5  ;;  %320 = vst.msk [vmem:[#allocation2 + $0x50] sm:$0xff] (!%p218_p2), %vm308_vm1, %v1696_v5  ;;  %v1454_v6 = vld [vmem:[%s1962_s3 + $0x1c] sm:$0xf] (!%p218_p2) }
   0xd   : > { %s1967_s22 = smov (!%p253_p3, %s1409_s22), 1  ;;  %319 = vst.msk [vmem:[#allocation2 + $0x48] sm:$0x3] %vm310_vm2, %v1696_v5  ;;  %321 = vst.msk [vmem:[#allocation2 + $0x58] sm:$0x3] %vm310_vm2, %v1696_v5 }
   0xe   : > { %322 = vst.msk [vmem:[#allocation2 + $0x60] sm:$0xff] %vm308_vm1, %v1696_v5  ;;  %324 = vst.msk [vmem:[#allocation2 + $0x70] sm:$0xff] %vm308_vm1, %v1696_v5  ;;  %s1466_s7 = sshll.u32 %s1967_s22, 6  ;;  %s265_s8 = scalar_lea.vmem %s1964_s5, %s1967_s22 }
   0xf   : > { %323 = vst.msk [vmem:[#allocation2 + $0x68] sm:$0x3] %vm310_vm2, %v1696_v5  ;;  %325 = vst.msk [vmem:[#allocation2 + $0x78] sm:$0x3] %vm310_vm2, %v1696_v5  ;;  %s257_s12 = scalar_lea.vmem %s1959_s0, %s1466_s7  ;;  %v339_v53 = vld [vmem:[#allocation2] sm:$0xff]  ;;  %s1914_s29 = scalar_lea.vmem %s1963_s4, %s1466_s7 }
  0x10   : > { %326 = vst.msk [vmem:[#allocation2 + $0x80] sm:$0xff] %vm308_vm1, %v1696_v5  ;;  %328 = vst.msk [vmem:[#allocation2 + $0x90] sm:$0xff] %vm308_vm1, %v1696_v5  ;;  %v270_v9 = vld [vmem:[%s257_s12] sm:$0xff]  ;;  %v271_v10 = vld [vmem:[%s257_s12 + $0x8] sm:$0xff]  ;;  %s268_s11 = scalar_lea.vmem %s1965_s6, %s1967_s22 }
  0x11   : > { %327 = vst.msk [vmem:[#allocation2 + $0x88] sm:$0x3] %vm310_vm2, %v1696_v5  ;;  %329 = vst.msk [vmem:[#allocation2 + $0x98] sm:$0x3] %vm310_vm2, %v1696_v5  ;;  %v272_v11 = vld [vmem:[%s257_s12 + $0x10] sm:$0xff]  ;;  %v285_v12 = vmul.f32 %v1418_v7, %v270_v9  ;;  %v286_v13 = vmul.f32 %v1418_v7, %v271_v10  ;;  %v273_v15 = vld [vmem:[%s257_s12 + $0x18] sm:$0xff] }
  0x12   : > { %v287_v14 = vmul.f32 %v1418_v7, %v272_v11  ;;  %v274_v16 = vld [vmem:[%s257_s12 + $0x20] sm:$0xff]  ;;  %v275_v17 = vld [vmem:[%s257_s12 + $0x28] sm:$0xff]  ;;  %v288_v18 = vmul.f32 %v1418_v7, %v273_v15  ;;  %v276_v20 = vld [vmem:[%s257_s12 + $0x30] sm:$0xff]  ;;  %v554_v11 = vsel %vm378_vm0, %v1429_v50, 0 }
  0x13   : > { %v289_v19 = vmul.f32 %v1418_v7, %v274_v16  ;;  %v290_v21 = vmul.f32 %v1418_v7, %v275_v17  ;;  %v277_v22 = vld [vmem:[%s257_s12 + $0x38] sm:$0xff]  ;;  %v300_v23 = vadd.f32 %v1419_v8, %v285_v12  ;;  %v301_v24 = vadd.f32 %v1419_v8, %v286_v13  ;;  %v352_v33 = vld [vmem:[#allocation2 + $0x1] sm:$0xff]  ;;  %v1434_v12 = vld [vmem:[%s1962_s3 + $0xc] sm:$0xf] }
  0x14   : > { %v302_v25 = vadd.f32 %v1419_v8, %v287_v14  ;;  %v291_v26 = vmul.f32 %v1418_v7, %v276_v20  ;;  %v303_v27 = vadd.f32 %v1419_v8, %v288_v18  ;;  %v292_v30 = vmul.f32 %v1418_v7, %v277_v22  ;;  %v527_v16 = vld [vmem:[#allocation2 + $0x2] sm:$0xff] }
  0x15   : > { %v304_v28 = vadd.f32 %v1419_v8, %v289_v19  ;;  %v305_v29 = vadd.f32 %v1419_v8, %v290_v21  ;;  %331 = vst.msk [vmem:[#allocation2 + $0x11] sm:$0xff] %vm308_vm1, %v300_v23  ;;  %332 = vst.msk [vmem:[#allocation2 + $0x21] sm:$0xff] %vm308_vm1, %v301_v24  ;;  %v1065_v19 = vsel %vm378_vm0, %v1454_v6, 0  ;;  %v1459_v20 = vld [vmem:[%s1962_s3 + $0x20] sm:$0xf] }
  0x16   : > { %333 = vst.msk [vmem:[#allocation2 + $0x31] sm:$0xff] %vm308_vm1, %v302_v25  ;;  %v306_v31 = vadd.f32 %v1419_v8, %v291_v26  ;;  %334 = vst.msk [vmem:[#allocation2 + $0x41] sm:$0xff] %vm308_vm1, %v303_v27  ;;  %v307_v32 = vadd.f32 %v1419_v8, %v292_v30  ;;  %v656_v25 = vsel %vm378_vm0, %v1434_v12, 0 }
  0x17   : > { %335 = vst.msk [vmem:[#allocation2 + $0x51] sm:$0xff] %vm308_vm1, %v304_v28  ;;  %336 = vst.msk [vmem:[#allocation2 + $0x61] sm:$0xff] %vm308_vm1, %v305_v29  ;;  %v943_v23 = vld [vmem:[#allocation2 + $0x90] sm:$0xff]  ;;  %v1167_v29 = vsel %vm378_vm0, %v1459_v20, 0 }
  0x18   : > { %337 = vst.msk [vmem:[#allocation2 + $0x71] sm:$0xff] %vm308_vm1, %v306_v31  ;;  %338 = vst.msk [vmem:[#allocation2 + $0x81] sm:$0xff] %vm308_vm1, %v307_v32  ;;  %v1045_v31 = vld [vmem:[#allocation2 + $0x91] sm:$0xff] }
  0x1c   : > { %v353_v34 = vld [vmem:[#allocation2 + $0x11] sm:$0xff]  ;;  %v732_v35 = vld [vmem:[#allocation2 + $0x21] sm:$0xff] }
  0x1d   : > { %v355_v36 = vld [vmem:[#allocation2 + $0x31] sm:$0xff]  ;;  %v360_v37 = vpack.c.bf16 %v353_v34, %v352_v33  ;;  %v739_v38 = vpack.c.bf16 %v732_v35, %v353_v34  ;;  %v734_v40 = vld [vmem:[#allocation2 + $0x41] sm:$0xff] }
  0x1e   : > { %v1810_v39 = vpack.c.bf16 %v355_v36, %v732_v35  ;;  %v1812_v41 = vld [vmem:[#allocation2 + $0x51] sm:$0xff]  ;;  %v740_v43 = vpack.c.bf16 %v734_v40, %v355_v36  ;;  %v834_v47 = vld [vmem:[#allocation2 + $0x22] sm:$0xff] }
  0x1f   : > { %v1818_v45 = vpack.c.bf16 %v1812_v41, %v734_v40  ;;  %v833_v46 = vld [vmem:[#allocation2 + $0x12] sm:$0xff]  ;;  %1515 = vmatprep.mubr.msk.bf16.mxu1 %vm308_vm1, %v360_v37  ;;  %1555 = vmatprep.mubr.msk.bf16.mxu0 %vm308_vm1, %v739_v38  ;;  %v1831_v51 = vld [vmem:[#allocation2 + $0x61] sm:$0xff] }
  0x20   : > { %v841_v48 = vpack.c.bf16 %v834_v47, %v833_v46  ;;  %1516 = vmatmul.mubr.msk.bf16.vlgmr.msra.gmra.mrb[0].mxu1 %vm308_vm1, %v1810_v39  ;;  %1556 = vmatmul.mubr.msk.bf16.vlgmr.msra.gmra.mrb[0].mxu0 %vm308_vm1, %v740_v43  ;;  %v1833_v52 = vld [vmem:[#allocation2 + $0x71] sm:$0xff]  ;;  %v836_v57 = vld [vmem:[#allocation2 + $0x42] sm:$0xff]  ;;  %v535_v18 = vpack.c.bf16 %v833_v46, %v527_v16  ;;  %v741_v35 = vpack.c.bf16 %v1831_v51, %v1812_v41 }
  0x21   : > { %1524 = vmatpush3.bf16.msra.mxu1 %v460_v42  ;;  %1564 = vmatpush3.bf16.msra.mxu0 %v860_v44  ;;  %v1838_v54 = vld [vmem:[#allocation2 + $0x10] sm:$0xff]  ;;  %v1844_v55 = vpack.c.bf16 %v1833_v52, %v1831_v51  ;;  %v838_v60 = vld [vmem:[#allocation2 + $0x62] sm:$0xff] }
  0x22   : > { %1519 = vmatprep.mubr.msk.bf16.mxu1 %vm308_vm1, %v1818_v45  ;;  %1565 = vmatprep.mubr.msk.bf16.mxu0 %vm308_vm1, %v841_v48  ;;  %v835_v56 = vld [vmem:[#allocation2 + $0x32] sm:$0xff]  ;;  %v347_v58 = vpack.c.bf16 %v1838_v54, %v339_v53  ;;  %v341_v62 = vld [vmem:[#allocation2 + $0x20] sm:$0xff] }
  0x23   : > { %1676 = vmatprep.subr.msk.bf16.mxu0 %vm378_vm0, %v1449_v49  ;;  %1671 = vmatprep.subr.msk.bf16.mxu1 %vm378_vm0, %v1429_v50  ;;  %v837_v59 = vld [vmem:[#allocation2 + $0x52] sm:$0xff]  ;;  %v842_v61 = vpack.c.bf16 %v836_v57, %v835_v56  ;;  %v343_v4 = vld [vmem:[#allocation2 + $0x40] sm:$0xff]  ;;  %v536_v21 = vpack.c.bf16 %v835_v56, %v834_v47  ;;  %v637_v28 = vpack.c.bf16 %v341_v62, %v1838_v54 }
  0x24   : > { %v342_v63 = vld [vmem:[#allocation2 + $0x30] sm:$0xff]  ;;  %v843_v0 = vpack.c.bf16 %v838_v60, %v837_v59  ;;  %v1856_v9 = vld [vmem:[#allocation2 + $0x82] sm:$0xff]  ;;  %v537_v24 = vpack.c.bf16 %v837_v59, %v836_v57 }
  0x25   : > { %v344_v5 = vld [vmem:[#allocation2 + $0x50] sm:$0xff]  ;;  %v348_v7 = vpack.c.bf16 %v342_v63, %v341_v62  ;;  %v345_v14 = vld [vmem:[#allocation2 + $0x60] sm:$0xff]  ;;  %v638_v30 = vpack.c.bf16 %v343_v4, %v342_v63 }
  0x26   : > { %v839_v8 = vld [vmem:[#allocation2 + $0x72] sm:$0xff]  ;;  %v349_v10 = vpack.c.bf16 %v344_v5, %v343_v4  ;;  %v942_v22 = vld [vmem:[#allocation2 + $0x80] sm:$0xff]  ;;  %v639_v32 = vpack.c.bf16 %v345_v14, %v344_v5 }
  0x27   : > { %v844_v13 = vpack.c.bf16 %v1856_v9, %v839_v8  ;;  %v346_v15 = vld [vmem:[#allocation2 + $0x70] sm:$0xff]  ;;  %v947_v26 = vpack.c.bf16 %v943_v23, %v942_v22  ;;  %v538_v27 = vpack.c.bf16 %v839_v8, %v838_v60 }
  0x28   : > { %1520 = vmatmul.mubr.msk.bf16.gmra.mrb[4].mxu1 %vm308_vm1, %v1844_v55  ;;  %v350_v17 = vpack.c.bf16 %v346_v15, %v345_v14  ;;  %v640_v34 = vpack.c.bf16 %v942_v22, %v346_v15 }
  0x29   : > { %1525 = vmatprep.mubr.msk.bf16.mxu1 %vm308_vm1, %v347_v58 }
  0x2c   : > { %1566 = vmatmul.mubr.msk.bf16.vlgmr.msra.gmra.mrb[0].mxu0 %vm308_vm1, %v842_v61 }
  0x2d   : > { %1574 = vmatpush3.bf16.msra.mxu0 %v963_v2  ;;  %1569 = vmatprep.mubr.msk.bf16.mxu0 %vm308_vm1, %v843_v0 }
  0x2e   : > { %1677 = vmatprep.subr.msk.bf16.mxu0 %vm378_vm0, %v1454_v6 }
  0x30   : > { %1526 = vmatmul.mubr.msk.bf16.vlgmr.msra.gmra.mrb[0].mxu1 %vm308_vm1, %v348_v7 }
  0x31   : > { %1534 = vmatpush3.bf16.msra.mxu1 %v554_v11  ;;  %1529 = vmatprep.mubr.msk.bf16.mxu1 %vm308_vm1, %v349_v10 }
  0x32   : > { %1672 = vmatprep.subr.msk.bf16.mxu1 %vm378_vm0, %v1434_v12 }
  0x34   : > { %1570 = vmatmul.mubr.msk.bf16.gmra.mrb[4].mxu0 %vm308_vm1, %v844_v13 }
  0x35   : > { %1575 = vmatprep.mubr.msk.bf16.mxu0 %vm308_vm1, %v348_v7 }
  0x38   : > { %1530 = vmatmul.mubr.msk.bf16.gmra.mrb[4].mxu1 %vm308_vm1, %v350_v17 }
  0x39   : > { %1535 = vmatprep.mubr.msk.bf16.mxu1 %vm308_vm1, %v535_v18 }
  0x3c   : > { %1576 = vmatmul.mubr.msk.bf16.vlgmr.msra.gmra.mrb[0].mxu0 %vm308_vm1, %v349_v10 }
  0x3d   : > { %1584 = vmatpush3.bf16.msra.mxu0 %v1065_v19  ;;  %1579 = vmatprep.mubr.msk.bf16.mxu0 %vm308_vm1, %v350_v17 }
  0x3e   : > { %1678 = vmatprep.subr.msk.bf16.mxu0 %vm378_vm0, %v1459_v20 }
  0x40   : > { %1536 = vmatmul.mubr.msk.bf16.vlgmr.msra.gmra.mrb[0].mxu1 %vm308_vm1, %v536_v21 }
  0x41   : > { %1544 = vmatpush3.bf16.msra.mxu1 %v656_v25  ;;  %1539 = vmatprep.mubr.msk.bf16.mxu1 %vm308_vm1, %v537_v24 }
  0x42   : > { %1674 = vmatprep.subr.msk.bf16.mxu1 %vm378_vm0, %v1746_v1  ;;  %v1044_v1 = vld [vmem:[#allocation2 + $0x81] sm:$0xff] }
  0x43   : > { %v1049_v33 = vpack.c.bf16 %v1045_v31, %v1044_v1  ;;  %v742_v36 = vpack.c.bf16 %v1044_v1, %v1833_v52 }
  0x44   : > { %1580 = vmatmul.mubr.msk.bf16.gmra.mrb[4].mxu0 %vm308_vm1, %v947_v26 }
  0x45   : > { %1585 = vmatprep.mubr.msk.bf16.mxu0 %vm308_vm1, %v1810_v39 }
  0x48   : > { %1540 = vmatmul.mubr.msk.bf16.gmra.mrb[4].mxu1 %vm308_vm1, %v538_v27 }
  0x49   : > { %1545 = vmatprep.mubr.msk.bf16.mxu1 %vm308_vm1, %v637_v28 }
  0x4c   : > { %1586 = vmatmul.mubr.msk.bf16.vlgmr.msra.gmra.mrb[0].mxu0 %vm308_vm1, %v1818_v45 }
  0x4d   : > { %1594 = vmatpush3.bf16.msra.mxu0 %v1167_v29  ;;  %1589 = vmatprep.mubr.msk.bf16.mxu0 %vm308_vm1, %v1844_v55 }
  0x50   : > { %1546 = vmatmul.mubr.msk.bf16.vlgmr.msra.gmra.mrb[0].mxu1 %vm308_vm1, %v638_v30 }
  0x51   : > { %1604 = vmatpush3.bf16.msra.mxu1 %v1754_v3  ;;  %1549 = vmatprep.mubr.msk.bf16.mxu1 %vm308_vm1, %v639_v32  ;;  %v1147_v3 = vld [vmem:[#allocation2 + $0x92] sm:$0xff] }
  0x52   : > { %v1151_v37 = vpack.c.bf16 %v1147_v3, %v1856_v9 }
  0x54   : > { %1590 = vmatmul.mubr.msk.bf16.gmra.mrb[4].mxu0 %vm308_vm1, %v1049_v33 }
  0x55   : > { %1595 = vmatprep.mubr.msk.bf16.mxu0 %vm308_vm1, %v536_v21 }
  0x58   : > { %1550 = vmatmul.mubr.msk.bf16.gmra.mrb[4].mxu1 %vm308_vm1, %v640_v34 }
  0x59   : > { %1559 = vmatprep.mubr.msk.bf16.mxu1 %vm308_vm1, %v741_v35 }
  0x5c   : > { %1596 = vmatmul.mubr.msk.bf16.vlgmr.msra.gmra.mrb[0].mxu0 %vm308_vm1, %v537_v24 }
  0x5d   : > { %1599 = vmatprep.mubr.msk.bf16.mxu0 %vm308_vm1, %v538_v27 }
  0x64   : > { %1560 = vmatmul.mubr.msk.bf16.vlgmr.msra.gmra.mrb[4].mxu1 %vm308_vm1, %v742_v36  ;;  %1600 = vmatmul.mubr.msk.bf16.gmra.mrb[4].mxu0 %vm308_vm1, %v1151_v37 }
 0x123   : > { %v1547_v38 = vpop.f32.mrb[0].mxu1 }
 0x124   : > { %v692_v39 = vpop.f32.mrb[1].mxu1 }
 0x125   : > { %v1548_v40 = vpop.f32.mrb[2].mxu1 }
 0x126   : > { %v695_v41 = vpop.f32.mrb[3].mxu1 }
 0x12f   : > { %v1597_v42 = vpop.f32.mrb[0].mxu0 }
 0x130   : > { %v1605_v43 = vadd.f32 %v1597_v42, %v1547_v38  ;;  %v1203_v44 = vpop.f32.mrb[1].mxu0 }
 0x131   : > { %v1606_v45 = vadd.f32 %v1203_v44, %v692_v39  ;;  %v1598_v46 = vpop.f32.mrb[2].mxu0 }
 0x132   : > { %1245 = vst.msk [vmem:[%s1914_s29 + $0x10] sm:$0xff] %vm1242_vm3, %v1605_v43  ;;  %v1607_v47 = vadd.f32 %v1598_v46, %v1548_v40  ;;  %v1206_v48 = vpop.f32.mrb[3].mxu0  ;;  %v1276_v51 = vmul.f32 %v1605_v43, %v1605_v43  ;;  %v1254_v57 = vsel %vm1242_vm3, %v1605_v43, 0.0 }
 0x133   : > { %1243 = vst.msk [vmem:[%s1914_s29] sm:$0xff] %vm1242_vm3, %v1606_v45  ;;  %v1274_v49 = vmul.f32 %v1606_v45, %v1606_v45  ;;  %v1608_v50 = vadd.f32 %v1206_v48, %v695_v41  ;;  %v1251_v52 = vsel %vm1242_vm3, %v1606_v45, 0.0 }
 0x134   : > { %1246 = vst.msk [vmem:[%s1914_s29 + $0x18] sm:$0xff] %vm1242_vm3, %v1607_v47  ;;  %v1277_v55 = vmul.f32 %v1607_v47, %v1607_v47  ;;  %v1285_v5 = vsel %vm1242_vm3, %v1276_v51, 0.0  ;;  %v1256_v6 = vsel %vm1242_vm3, %v1607_v47, 0.0 }
 0x135   : > { %1244 = vst.msk [vmem:[%s1914_s29 + $0x8] sm:$0xff] %vm1242_vm3, %v1608_v50  ;;  %v1252_v53 = vsel %vm1242_vm3, %v1608_v50, 0.0  ;;  %v1275_v54 = vmul.f32 %v1608_v50, %v1608_v50  ;;  %v1282_v58 = vsel %vm1242_vm3, %v1274_v49, 0.0 }
 0x136   : > { %v1253_v56 = vadd.f32 %v1252_v53, %v1251_v52  ;;  %v1287_v10 = vsel %vm1242_vm3, %v1277_v55, 0.0 }
 0x137   : > { %v1283_v59 = vsel %vm1242_vm3, %v1275_v54, 0.0  ;;  %v1561_v60 = vpop.f32.mrb[4].mxu1  ;;  %v1601_v61 = vpop.f32.mrb[4].mxu0 }
 0x138   : > { %v1255_v62 = vadd.f32 %v1254_v57, %v1253_v56  ;;  %v1284_v63 = vadd.f32 %v1283_v59, %v1282_v58  ;;  %v1609_v0 = vadd.f32 %v1601_v61, %v1561_v60  ;;  %v810_v2 = vpop.f32.mrb[5].mxu1  ;;  %v1219_v4 = vpop.f32.mrb[5].mxu0 }
 0x139   : > { %v1610_v7 = vadd.f32 %v1219_v4, %v810_v2  ;;  %v1562_v8 = vpop.f32.mrb[6].mxu1  ;;  %v1602_v9 = vpop.f32.mrb[6].mxu0 }
 0x13a   : > { %v1286_v11 = vadd.f32 %v1285_v5, %v1284_v63  ;;  %1249 = vst.msk [vmem:[%s1914_s29 + $0x30] sm:$0xff] %vm1242_vm3, %v1609_v0  ;;  %v1257_v12 = vadd.f32 %v1256_v6, %v1255_v62  ;;  %v813_v13 = vpop.f32.mrb[7].mxu1  ;;  %v1222_v14 = vpop.f32.mrb[7].mxu0  ;;  %v1611_v17 = vadd.f32 %v1602_v9, %v1562_v8  ;;  %v1280_v23 = vmul.f32 %v1609_v0, %v1609_v0 }
 0x13b   : > { %1247 = vst.msk [vmem:[%s1914_s29 + $0x20] sm:$0xff] %vm1242_vm3, %v1610_v7  ;;  %v1258_v15 = vsel %vm1242_vm3, %v1610_v7, 0.0  ;;  %v1278_v16 = vmul.f32 %v1610_v7, %v1610_v7  ;;  %v1612_v18 = vadd.f32 %v1222_v14, %v813_v13  ;;  %v1262_v27 = vsel %vm1242_vm3, %v1609_v0, 0.0 }
 0x13c   : > { %v1259_v19 = vadd.f32 %v1258_v15, %v1257_v12  ;;  %v1288_v20 = vadd.f32 %v1287_v10, %v1286_v11  ;;  %1250 = vst.msk [vmem:[%s1914_s29 + $0x38] sm:$0xff] %vm1242_vm3, %v1611_v17  ;;  %v1281_v28 = vmul.f32 %v1611_v17, %v1611_v17  ;;  %v1264_v1 = vsel %vm1242_vm3, %v1611_v17, 0.0 }
 0x13d   : > { %v1289_v21 = vsel %vm1242_vm3, %v1278_v16, 0.0  ;;  %1248 = vst.msk [vmem:[%s1914_s29 + $0x28] sm:$0xff] %vm1242_vm3, %v1612_v18  ;;  %v1260_v22 = vsel %vm1242_vm3, %v1612_v18, 0.0  ;;  %v1279_v26 = vmul.f32 %v1612_v18, %v1612_v18  ;;  %v1293_v32 = vsel %vm1242_vm3, %v1280_v23, 0.0 }
 0x13e   : > { %v1290_v24 = vadd.f32 %v1289_v21, %v1288_v20  ;;  %v1261_v25 = vadd.f32 %v1260_v22, %v1259_v19  ;;  %v1295_v35 = vsel %vm1242_vm3, %v1281_v28, 0.0 }
 0x13f   : > { %v1291_v30 = vsel %vm1242_vm3, %v1279_v26, 0.0 }
 0x140   : > { %v1263_v29 = vadd.f32 %v1262_v27, %v1261_v25  ;;  %v1292_v31 = vadd.f32 %v1291_v30, %v1290_v24 }
 0x142   : > { %v1265_v33 = vadd.f32 %v1264_v1, %v1263_v29  ;;  %v1294_v34 = vadd.f32 %v1293_v32, %v1292_v31 }
 0x144   : > { %v1266_v3 = vrot.slane %v1265_v33, 4  ;;  %v1296_v36 = vadd.f32 %v1295_v35, %v1294_v34 }
 0x146   : > { %v1267_v37 = vadd.f32 %v1266_v3, %v1265_v33  ;;  %v1297_v38 = vrot.slane %v1296_v36, 4 }
 0x148   : > { %v1268_v39 = vrot.slane %v1267_v37, 2  ;;  %v1298_v40 = vadd.f32 %v1297_v38, %v1296_v36 }
 0x14a   : > { %v1269_v41 = vadd.f32 %v1268_v39, %v1267_v37  ;;  %v1299_v42 = vrot.slane %v1298_v40, 2 }
 0x14c   : > { %v1270_v43 = vrot.slane %v1269_v41, 1  ;;  %v1300_v44 = vadd.f32 %v1299_v42, %v1298_v40 }
 0x14e   : > { %v1271_v45 = vadd.f32 %v1270_v43, %v1269_v41  ;;  %v1301_v46 = vrot.slane %v1300_v44, 1 }
 0x150   : > { %1273 = vst.msk [vmem:[%s265_s8] sm:$0x1] %vm1272_vm4, %v1271_v45  ;;  %v1302_v47 = vadd.f32 %v1301_v46, %v1300_v44 }
 0x152   : > { %1303 = vst.msk [vmem:[%s268_s11] sm:$0x1] %vm1272_vm4, %v1302_v47 }
 0x153 PF: > { %s17_s21 = sadd.s32 1, %s1694_s21  }
 0x154   : > { %p14_p4 = scmp.ge.s32.totalorder %s17_s21, 4  }
 0x156   :  { %16 = sbr.rel (!%p14_p4) target bundleno = 1 (0x1), region = 100 }

</bundles_post_ra>
